<compile_context>
chip_gen: v5e
topology: v5e:2x2
jax: 0.10.0
libtpu: 0.0.40
codegen_flags: <defaults>
</compile_context>

<pallas_src>
import functools

import jax
import jax.numpy as jnp
from jax.experimental import pallas as pl
from jax.experimental.pallas import tpu as pltpu


# ----------------------------- Pallas kernel ------------------------------ #
def _conv_block_kernel(p_ref, w_ref, b_ref, o_ref, *, use_norm, use_act,
                       eps, slope, inv_p):
    # p_ref: (1, K, P) bf16 patches for one batch element, K = C_in*KH*KW.
    # w_ref: (C_out, K) bf16 weights, b_ref: (C_out, 1) f32 bias.
    # o_ref: (1, C_out, P) f32 output (lane-dense along P).
    x = p_ref[0]                                            # (K, P) bf16
    w = w_ref[...]                                          # (C_out, K) bf16
    y = jnp.dot(w, x, preferred_element_type=jnp.float32)   # MXU, f32 acc
    y = y + b_ref[...]                                      # (C_out, P) f32
    if use_norm:
        # InstanceNorm2d (affine=False): normalize per channel over spatial
        # positions (P), biased variance, eps=1e-5.
        # Single-pass stats: var = E[y^2] - E[y]^2.
        s = jnp.sum(y, axis=1, keepdims=True)
        ss = jnp.sum(y * y, axis=1, keepdims=True)
        mean = s * inv_p
        var = ss * inv_p - mean * mean
        y = (y - mean) * jax.lax.rsqrt(var + eps)
    if use_act:
        # LeakyReLU(0.2)
        y = jnp.where(y >= 0, y, slope * y)
    o_ref[0] = y.astype(o_ref.dtype)


# ------------------------------ glue (JAX) -------------------------------- #
def _im2col_kp(x, kh, kw, stride, pad):
    """x: (N, C, H, W) -> patches (N, K, P), K = C*kh*kw (c-major), P = OH*OW."""
    x = jnp.pad(x, ((0, 0), (0, 0), (pad, pad), (pad, pad)))
    n, c, h, w = x.shape
    oh = (h - kh) // stride + 1
    ow = (w - kw) // stride + 1
    cols = []
    for i in range(kh):
        for j in range(kw):
            cols.append(x[:, :, i:i + stride * oh:stride,
                             j:j + stride * ow:stride])
    patches = jnp.stack(cols, axis=2)                  # (N, C, KH*KW, OH, OW)
    patches = patches.reshape(n, c * kh * kw, oh * ow)  # (N, K, P)  -- no transpose
    return patches, oh, ow


def conv_block_pallas(x, weight, bias, *, stride, pad, use_norm, use_act):
    """x: (N, C_in, H, W) f32; weight: (C_out, C_in, KH, KW); bias: (C_out,)."""
    c_out, c_in, kh, kw = weight.shape
    # bf16 matmul operands; accumulation stays f32 inside the kernel.
    patches, oh, ow = _im2col_kp(x.astype(jnp.bfloat16), kh, kw, stride, pad)
    n, k, p = patches.shape
    w2 = weight.reshape(c_out, c_in * kh * kw).astype(jnp.bfloat16)  # (C_out, K)
    b2 = bias.reshape(c_out, 1).astype(jnp.float32)                  # (C_out, 1)

    kernel = functools.partial(_conv_block_kernel, use_norm=use_norm,
                               use_act=use_act, eps=1e-5, slope=0.2,
                               inv_p=1.0 / float(p))
    out = pl.pallas_call(
        kernel,
        out_shape=jax.ShapeDtypeStruct((n, c_out, p), jnp.float32),
        grid_spec=pltpu.PrefetchScalarGridSpec(
            num_scalar_prefetch=0,
            grid=(n,),
            in_specs=[
                pl.BlockSpec((1, k, p), lambda i: (i, 0, 0)),
                pl.BlockSpec((c_out, k), lambda i: (0, 0)),
                pl.BlockSpec((c_out, 1), lambda i: (0, 0)),
            ],
            out_specs=pl.BlockSpec((1, c_out, p), lambda i: (i, 0, 0)),
        ),
        compiler_params=pltpu.CompilerParams(
            dimension_semantics=("parallel",)),
    )(patches, w2, b2)
    # (N, C_out, P) is already NCHW once P is unflattened -- no output transpose.
    return out.reshape(n, c_out, oh, ow)


# --------------------------- module definition ----------------------------- #
# (stride, use_norm, use_act) per block -- fixed by the PyTorch module.
_BLOCK_CFG = [
    (2, False, True),
    (2, True,  True),
    (2, True,  True),
    (1, True,  True),
    (1, False, False),
]


def init_patch_discriminator_params(key, input_channel, n_df):
    """Deterministic synthetic params matching the PyTorch module's shapes."""
    channels = [input_channel, n_df, 2 * n_df, 4 * n_df, 8 * n_df, 1]
    params = []
    for cin, cout in zip(channels[:-1], channels[1:]):
        key, kw_, kb_ = jax.random.split(key, 3)
        fan_in = cin * 4 * 4
        scale = 1.0 / (fan_in ** 0.5)
        w = jax.random.uniform(kw_, (cout, cin, 4, 4), jnp.float32,
                               -scale, scale)
        b = jax.random.uniform(kb_, (cout,), jnp.float32, -scale, scale)
        params.append((w, b))
    return params


def patch_discriminator_forward(params, x):
    """Returns the list of the 5 block outputs (== result[1:] in PyTorch)."""
    outs = []
    h = x
    for (w, b), (stride, use_norm, use_act) in zip(params, _BLOCK_CFG):
        h = conv_block_pallas(h, w, b, stride=stride, pad=1,
                              use_norm=use_norm, use_act=use_act)
        outs.append(h)
    return outs


# ------------------------------- reference --------------------------------- #
def _conv_ref(x, w, b, stride, pad):
    y = jax.lax.conv_general_dilated(
        x, w, (stride, stride), ((pad, pad), (pad, pad)),
        dimension_numbers=("NCHW", "OIHW", "NCHW"))
    return y + b.reshape(1, -1, 1, 1)


def _instance_norm_ref(x, eps=1e-5):
    mean = x.mean(axis=(2, 3), keepdims=True)
    var = ((x - mean) ** 2).mean(axis=(2, 3), keepdims=True)
    return (x - mean) * jax.lax.rsqrt(var + eps)


def patch_discriminator_reference(params, x):
    outs = []
    h = x
    for (w, b), (stride, use_norm, use_act) in zip(params, _BLOCK_CFG):
        h = _conv_ref(h, w, b, stride, 1)
        if use_norm:
            h = _instance_norm_ref(h)
        if use_act:
            h = jnp.where(h >= 0, h, 0.2 * h)
        outs.append(h)
    return outs


# ---------------------------------- main ----------------------------------- #
if __name__ == "__main__":
    # Small config: opt.input_ch=3, opt.target_ch=1, opt.n_df=8.
    input_ch, target_ch, n_df = 3, 1, 8
    input_channel = input_ch + target_ch
    N, H, W = 2, 32, 32  # 32x32 so all 5 blocks keep valid (>=1) spatial dims

    key = jax.random.PRNGKey(0)
    k_params, k_x = jax.random.split(key)
    params = init_patch_discriminator_params(k_params, input_channel, n_df)
    x = jax.random.normal(k_x, (N, input_channel, H, W), jnp.float32)

    fwd = jax.jit(patch_discriminator_forward)
    outs = fwd(params, x)
    outs = [jax.block_until_ready(o) for o in outs]

    # Sanity check against a pure-f32 JAX reference (kernel uses bf16 matmul
    # operands with f32 accumulation, hence the slightly loosened tolerance).
    refs = patch_discriminator_reference(params, x)
    expected_channels = [n_df, 2 * n_df, 4 * n_df, 8 * n_df, 1]
    expected_spatial = [16, 8, 4, 3, 2]
    for i, (o, r) in enumerate(zip(outs, refs)):
        assert o.shape == (N, expected_channels[i],
                           expected_spatial[i], expected_spatial[i]), o.shape
        err = jnp.max(jnp.abs(o - r))
        assert jnp.allclose(o, r, rtol=2e-2, atol=2e-2), \
            f"mismatch block {i}, max abs err {err}"

    print("KERNEL_OK")
</pallas_src>

<mosaic_0001>
module attributes {stable_mosaic.version = 11 : i64} {
  func.func @_conv_block_kernel(%arg0: i32, %arg1: memref<1x64x256xbf16, #tpu.memory_space<vmem>>, %arg2: memref<8x64xbf16, #tpu.memory_space<vmem>>, %arg3: memref<8x1xf32, #tpu.memory_space<vmem>>, %arg4: memref<1x8x256xf32, #tpu.memory_space<vmem>>) attributes {dimension_semantics = [#tpu.dimension_semantics<parallel>], iteration_bounds = array<i64: 2>, scalar_prefetch = 0 : i64, scratch_operands = 0 : i64, tpu.core_type = #tpu.core_type<tc>, window_params = [{transform_indices = @transform_0, window_bounds = array<i64: 1, 64, 256>}, {pipeline_mode = #tpu.pipeline_mode<synchronous>, transform_indices = @transform_1, window_bounds = array<i64: 8, 64>}, {pipeline_mode = #tpu.pipeline_mode<synchronous>, transform_indices = @transform_2, window_bounds = array<i64: 8, 1>}, {transform_indices = @transform_3, window_bounds = array<i64: 1, 8, 256>}]} {
    %c0 = arith.constant 0 : index
    %c0_0 = arith.constant 0 : index
    %c0_1 = arith.constant 0 : index
    %0 = vector.load %arg1[%c0, %c0_0, %c0_1] : memref<1x64x256xbf16, #tpu.memory_space<vmem>>, vector<1x64x256xbf16>
    %1 = vector.shape_cast %0 : vector<1x64x256xbf16> to vector<64x256xbf16>
    %c0_2 = arith.constant 0 : index
    %c0_3 = arith.constant 0 : index
    %2 = vector.load %arg2[%c0_2, %c0_3] : memref<8x64xbf16, #tpu.memory_space<vmem>>, vector<8x64xbf16>
    %cst = arith.constant dense<0.000000e+00> : vector<8x256xf32>
    %3 = tpu.matmul %2, %1, %cst {dimension_numbers = #tpu.dot_dimension_numbers<[1], [0], [0], [1], [0, 0, 1, 1], [], []>} : vector<8x64xbf16>, vector<64x256xbf16>, vector<8x256xf32> -> vector<8x256xf32>
    %c0_4 = arith.constant 0 : index
    %c0_5 = arith.constant 0 : index
    %4 = vector.load %arg3[%c0_4, %c0_5] : memref<8x1xf32, #tpu.memory_space<vmem>>, vector<8x1xf32>
    %5 = vector.broadcast %4 : vector<8x1xf32> to vector<8x256xf32>
    %6 = arith.addf %3, %5 : vector<8x256xf32>
    %cst_6 = arith.constant 0.000000e+00 : f32
    %7 = vector.broadcast %cst_6 : f32 to vector<8x256xf32>
    %8 = arith.cmpf oge, %6, %7 : vector<8x256xf32>
    %cst_7 = arith.constant 2.000000e-01 : f32
    %9 = vector.broadcast %cst_7 : f32 to vector<8x256xf32>
    %10 = arith.mulf %9, %6 : vector<8x256xf32>
    %11 = arith.select %8, %6, %10 : vector<8x256xi1>, vector<8x256xf32>
    %c0_8 = arith.constant 0 : index
    %c0_9 = arith.constant 0 : index
    %c0_10 = arith.constant 0 : index
    %12 = vector.load %arg4[%c0_8, %c0_9, %c0_10] : memref<1x8x256xf32, #tpu.memory_space<vmem>>, vector<1x8x256xf32>
    %13 = vector.shape_cast %12 : vector<1x8x256xf32> to vector<8x256xf32>
    %14 = vector.shape_cast %11 : vector<8x256xf32> to vector<1x8x256xf32>
    tpu.vector_store %arg4[%c0_8, %c0_9, %c0_10], %14 {strides = array<i32>} : memref<1x8x256xf32, #tpu.memory_space<vmem>>, vector<1x8x256xf32>,
    return
  }
  func.func @transform_0(%arg0: i32) -> (i32, i32, i32) {
    %c0_i32 = arith.constant 0 : i32
    %c0_i32_0 = arith.constant 0 : i32
    %c0_i32_1 = arith.constant 0 : i32
    return %arg0, %c0_i32, %c0_i32_0 : i32, i32, i32
  }
  func.func @transform_1(%arg0: i32) -> (i32, i32) {
    %c0_i32 = arith.constant 0 : i32
    %c0_i32_0 = arith.constant 0 : i32
    %c0_i32_1 = arith.constant 0 : i32
    return %c0_i32, %c0_i32_0 : i32, i32
  }
  func.func @transform_2(%arg0: i32) -> (i32, i32) {
    %c0_i32 = arith.constant 0 : i32
    %c0_i32_0 = arith.constant 0 : i32
    %c0_i32_1 = arith.constant 0 : i32
    return %c0_i32, %c0_i32_0 : i32, i32
  }
  func.func @transform_3(%arg0: i32) -> (i32, i32, i32) {
    %c0_i32 = arith.constant 0 : i32
    %c0_i32_0 = arith.constant 0 : i32
    %c0_i32_1 = arith.constant 0 : i32
    return %arg0, %c0_i32, %c0_i32_0 : i32, i32, i32
  }
}

module attributes {stable_mosaic.version = 11 : i64} {
  func.func @_conv_block_kernel(%arg0: i32, %arg1: memref<1x128x64xbf16, #tpu.memory_space<vmem>>, %arg2: memref<16x128xbf16, #tpu.memory_space<vmem>>, %arg3: memref<16x1xf32, #tpu.memory_space<vmem>>, %arg4: memref<1x16x64xf32, #tpu.memory_space<vmem>>) attributes {dimension_semantics = [#tpu.dimension_semantics<parallel>], iteration_bounds = array<i64: 2>, scalar_prefetch = 0 : i64, scratch_operands = 0 : i64, tpu.core_type = #tpu.core_type<tc>, window_params = [{transform_indices = @transform_0, window_bounds = array<i64: 1, 128, 64>}, {pipeline_mode = #tpu.pipeline_mode<synchronous>, transform_indices = @transform_1, window_bounds = array<i64: 16, 128>}, {pipeline_mode = #tpu.pipeline_mode<synchronous>, transform_indices = @transform_2, window_bounds = array<i64: 16, 1>}, {transform_indices = @transform_3, window_bounds = array<i64: 1, 16, 64>}]} {
    %c0 = arith.constant 0 : index
    %c0_0 = arith.constant 0 : index
    %c0_1 = arith.constant 0 : index
    %0 = vector.load %arg1[%c0, %c0_0, %c0_1] : memref<1x128x64xbf16, #tpu.memory_space<vmem>>, vector<1x128x64xbf16>
    %1 = vector.shape_cast %0 : vector<1x128x64xbf16> to vector<128x64xbf16>
    %c0_2 = arith.constant 0 : index
    %c0_3 = arith.constant 0 : index
    %2 = vector.load %arg2[%c0_2, %c0_3] : memref<16x128xbf16, #tpu.memory_space<vmem>>, vector<16x128xbf16>
    %cst = arith.constant dense<0.000000e+00> : vector<16x64xf32>
    %3 = tpu.matmul %2, %1, %cst {dimension_numbers = #tpu.dot_dimension_numbers<[1], [0], [0], [1], [0, 0, 1, 1], [], []>} : vector<16x128xbf16>, vector<128x64xbf16>, vector<16x64xf32> -> vector<16x64xf32>
    %c0_4 = arith.constant 0 : index
    %c0_5 = arith.constant 0 : index
    %4 = vector.load %arg3[%c0_4, %c0_5] : memref<16x1xf32, #tpu.memory_space<vmem>>, vector<16x1xf32>
    %5 = vector.broadcast %4 : vector<16x1xf32> to vector<16x64xf32>
    %6 = arith.addf %3, %5 : vector<16x64xf32>
    %cst_6 = arith.constant dense<0.000000e+00> : vector<16xf32>
    %7 = vector.multi_reduction <add>, %6, %cst_6 [1] : vector<16x64xf32> to vector<16xf32>
    %8 = vector.shape_cast %7 : vector<16xf32> to vector<16x1xf32>
    %9 = arith.mulf %6, %6 : vector<16x64xf32>
    %cst_7 = arith.constant dense<0.000000e+00> : vector<16xf32>
    %10 = vector.multi_reduction <add>, %9, %cst_7 [1] : vector<16x64xf32> to vector<16xf32>
    %11 = vector.shape_cast %10 : vector<16xf32> to vector<16x1xf32>
    %cst_8 = arith.constant 1.562500e-02 : f32
    %12 = vector.broadcast %cst_8 : f32 to vector<16x1xf32>
    %13 = arith.mulf %8, %12 : vector<16x1xf32>
    %cst_9 = arith.constant 1.562500e-02 : f32
    %14 = vector.broadcast %cst_9 : f32 to vector<16x1xf32>
    %15 = arith.mulf %11, %14 : vector<16x1xf32>
    %16 = arith.mulf %13, %13 : vector<16x1xf32>
    %17 = arith.subf %15, %16 : vector<16x1xf32>
    %18 = vector.broadcast %13 : vector<16x1xf32> to vector<16x64xf32>
    %19 = arith.subf %6, %18 : vector<16x64xf32>
    %cst_10 = arith.constant 9.99999974E-6 : f32
    %20 = vector.broadcast %cst_10 : f32 to vector<16x1xf32>
    %21 = arith.addf %17, %20 : vector<16x1xf32>
    %22 = math.rsqrt %21 : vector<16x1xf32>
    %23 = vector.broadcast %22 : vector<16x1xf32> to vector<16x64xf32>
    %24 = arith.mulf %19, %23 : vector<16x64xf32>
    %cst_11 = arith.constant 0.000000e+00 : f32
    %25 = vector.broadcast %cst_11 : f32 to vector<16x64xf32>
    %26 = arith.cmpf oge, %24, %25 : vector<16x64xf32>
    %cst_12 = arith.constant 2.000000e-01 : f32
    %27 = vector.broadcast %cst_12 : f32 to vector<16x64xf32>
    %28 = arith.mulf %27, %24 : vector<16x64xf32>
    %29 = arith.select %26, %24, %28 : vector<16x64xi1>, vector<16x64xf32>
    %c0_13 = arith.constant 0 : index
    %c0_14 = arith.constant 0 : index
    %c0_15 = arith.constant 0 : index
    %30 = vector.load %arg4[%c0_13, %c0_14, %c0_15] : memref<1x16x64xf32, #tpu.memory_space<vmem>>, vector<1x16x64xf32>
    %31 = vector.shape_cast %30 : vector<1x16x64xf32> to vector<16x64xf32>
    %32 = vector.shape_cast %29 : vector<16x64xf32> to vector<1x16x64xf32>
    tpu.vector_store %arg4[%c0_13, %c0_14, %c0_15], %32 {strides = array<i32>} : memref<1x16x64xf32, #tpu.memory_space<vmem>>, vector<1x16x64xf32>,
    return
  }
  func.func @transform_0(%arg0: i32) -> (i32, i32, i32) {
    %c0_i32 = arith.constant 0 : i32
    %c0_i32_0 = arith.constant 0 : i32
    %c0_i32_1 = arith.constant 0 : i32
    return %arg0, %c0_i32, %c0_i32_0 : i32, i32, i32
  }
  func.func @transform_1(%arg0: i32) -> (i32, i32) {
    %c0_i32 = arith.constant 0 : i32
    %c0_i32_0 = arith.constant 0 : i32
    %c0_i32_1 = arith.constant 0 : i32
    return %c0_i32, %c0_i32_0 : i32, i32
  }
  func.func @transform_2(%arg0: i32) -> (i32, i32) {
    %c0_i32 = arith.constant 0 : i32
    %c0_i32_0 = arith.constant 0 : i32
    %c0_i32_1 = arith.constant 0 : i32
    return %c0_i32, %c0_i32_0 : i32, i32
  }
  func.func @transform_3(%arg0: i32) -> (i32, i32, i32) {
    %c0_i32 = arith.constant 0 : i32
    %c0_i32_0 = arith.constant 0 : i32
    %c0_i32_1 = arith.constant 0 : i32
    return %arg0, %c0_i32, %c0_i32_0 : i32, i32, i32
  }
}

module attributes {stable_mosaic.version = 11 : i64} {
  func.func @_conv_block_kernel(%arg0: i32, %arg1: memref<1x256x16xbf16, #tpu.memory_space<vmem>>, %arg2: memref<32x256xbf16, #tpu.memory_space<vmem>>, %arg3: memref<32x1xf32, #tpu.memory_space<vmem>>, %arg4: memref<1x32x16xf32, #tpu.memory_space<vmem>>) attributes {dimension_semantics = [#tpu.dimension_semantics<parallel>], iteration_bounds = array<i64: 2>, scalar_prefetch = 0 : i64, scratch_operands = 0 : i64, tpu.core_type = #tpu.core_type<tc>, window_params = [{transform_indices = @transform_0, window_bounds = array<i64: 1, 256, 16>}, {pipeline_mode = #tpu.pipeline_mode<synchronous>, transform_indices = @transform_1, window_bounds = array<i64: 32, 256>}, {pipeline_mode = #tpu.pipeline_mode<synchronous>, transform_indices = @transform_2, window_bounds = array<i64: 32, 1>}, {transform_indices = @transform_3, window_bounds = array<i64: 1, 32, 16>}]} {
    %c0 = arith.constant 0 : index
    %c0_0 = arith.constant 0 : index
    %c0_1 = arith.constant 0 : index
    %0 = vector.load %arg1[%c0, %c0_0, %c0_1] : memref<1x256x16xbf16, #tpu.memory_space<vmem>>, vector<1x256x16xbf16>
    %1 = vector.shape_cast %0 : vector<1x256x16xbf16> to vector<256x16xbf16>
    %c0_2 = arith.constant 0 : index
    %c0_3 = arith.constant 0 : index
    %2 = vector.load %arg2[%c0_2, %c0_3] : memref<32x256xbf16, #tpu.memory_space<vmem>>, vector<32x256xbf16>
    %cst = arith.constant dense<0.000000e+00> : vector<32x16xf32>
    %3 = tpu.matmul %2, %1, %cst {dimension_numbers = #tpu.dot_dimension_numbers<[1], [0], [0], [1], [0, 0, 1, 1], [], []>} : vector<32x256xbf16>, vector<256x16xbf16>, vector<32x16xf32> -> vector<32x16xf32>
    %c0_4 = arith.constant 0 : index
    %c0_5 = arith.constant 0 : index
    %4 = vector.load %arg3[%c0_4, %c0_5] : memref<32x1xf32, #tpu.memory_space<vmem>>, vector<32x1xf32>
    %5 = vector.broadcast %4 : vector<32x1xf32> to vector<32x16xf32>
    %6 = arith.addf %3, %5 : vector<32x16xf32>
    %cst_6 = arith.constant dense<0.000000e+00> : vector<32xf32>
    %7 = vector.multi_reduction <add>, %6, %cst_6 [1] : vector<32x16xf32> to vector<32xf32>
    %8 = vector.shape_cast %7 : vector<32xf32> to vector<32x1xf32>
    %9 = arith.mulf %6, %6 : vector<32x16xf32>
    %cst_7 = arith.constant dense<0.000000e+00> : vector<32xf32>
    %10 = vector.multi_reduction <add>, %9, %cst_7 [1] : vector<32x16xf32> to vector<32xf32>
    %11 = vector.shape_cast %10 : vector<32xf32> to vector<32x1xf32>
    %cst_8 = arith.constant 6.250000e-02 : f32
    %12 = vector.broadcast %cst_8 : f32 to vector<32x1xf32>
    %13 = arith.mulf %8, %12 : vector<32x1xf32>
    %cst_9 = arith.constant 6.250000e-02 : f32
    %14 = vector.broadcast %cst_9 : f32 to vector<32x1xf32>
    %15 = arith.mulf %11, %14 : vector<32x1xf32>
    %16 = arith.mulf %13, %13 : vector<32x1xf32>
    %17 = arith.subf %15, %16 : vector<32x1xf32>
    %18 = vector.broadcast %13 : vector<32x1xf32> to vector<32x16xf32>
    %19 = arith.subf %6, %18 : vector<32x16xf32>
    %cst_10 = arith.constant 9.99999974E-6 : f32
    %20 = vector.broadcast %cst_10 : f32 to vector<32x1xf32>
    %21 = arith.addf %17, %20 : vector<32x1xf32>
    %22 = math.rsqrt %21 : vector<32x1xf32>
    %23 = vector.broadcast %22 : vector<32x1xf32> to vector<32x16xf32>
    %24 = arith.mulf %19, %23 : vector<32x16xf32>
    %cst_11 = arith.constant 0.000000e+00 : f32
    %25 = vector.broadcast %cst_11 : f32 to vector<32x16xf32>
    %26 = arith.cmpf oge, %24, %25 : vector<32x16xf32>
    %cst_12 = arith.constant 2.000000e-01 : f32
    %27 = vector.broadcast %cst_12 : f32 to vector<32x16xf32>
    %28 = arith.mulf %27, %24 : vector<32x16xf32>
    %29 = arith.select %26, %24, %28 : vector<32x16xi1>, vector<32x16xf32>
    %c0_13 = arith.constant 0 : index
    %c0_14 = arith.constant 0 : index
    %c0_15 = arith.constant 0 : index
    %30 = vector.load %arg4[%c0_13, %c0_14, %c0_15] : memref<1x32x16xf32, #tpu.memory_space<vmem>>, vector<1x32x16xf32>
    %31 = vector.shape_cast %30 : vector<1x32x16xf32> to vector<32x16xf32>
    %32 = vector.shape_cast %29 : vector<32x16xf32> to vector<1x32x16xf32>
    tpu.vector_store %arg4[%c0_13, %c0_14, %c0_15], %32 {strides = array<i32>} : memref<1x32x16xf32, #tpu.memory_space<vmem>>, vector<1x32x16xf32>,
    return
  }
  func.func @transform_0(%arg0: i32) -> (i32, i32, i32) {
    %c0_i32 = arith.constant 0 : i32
    %c0_i32_0 = arith.constant 0 : i32
    %c0_i32_1 = arith.constant 0 : i32
    return %arg0, %c0_i32, %c0_i32_0 : i32, i32, i32
  }
  func.func @transform_1(%arg0: i32) -> (i32, i32) {
    %c0_i32 = arith.constant 0 : i32
    %c0_i32_0 = arith.constant 0 : i32
    %c0_i32_1 = arith.constant 0 : i32
    return %c0_i32, %c0_i32_0 : i32, i32
  }
  func.func @transform_2(%arg0: i32) -> (i32, i32) {
    %c0_i32 = arith.constant 0 : i32
    %c0_i32_0 = arith.constant 0 : i32
    %c0_i32_1 = arith.constant 0 : i32
    return %c0_i32, %c0_i32_0 : i32, i32
  }
  func.func @transform_3(%arg0: i32) -> (i32, i32, i32) {
    %c0_i32 = arith.constant 0 : i32
    %c0_i32_0 = arith.constant 0 : i32
    %c0_i32_1 = arith.constant 0 : i32
    return %arg0, %c0_i32, %c0_i32_0 : i32, i32, i32
  }
}

module attributes {stable_mosaic.version = 11 : i64} {
  func.func @_conv_block_kernel(%arg0: i32, %arg1: memref<1x512x9xbf16, #tpu.memory_space<vmem>>, %arg2: memref<64x512xbf16, #tpu.memory_space<vmem>>, %arg3: memref<64x1xf32, #tpu.memory_space<vmem>>, %arg4: memref<1x64x9xf32, #tpu.memory_space<vmem>>) attributes {dimension_semantics = [#tpu.dimension_semantics<parallel>], iteration_bounds = array<i64: 2>, scalar_prefetch = 0 : i64, scratch_operands = 0 : i64, tpu.core_type = #tpu.core_type<tc>, window_params = [{transform_indices = @transform_0, window_bounds = array<i64: 1, 512, 9>}, {pipeline_mode = #tpu.pipeline_mode<synchronous>, transform_indices = @transform_1, window_bounds = array<i64: 64, 512>}, {pipeline_mode = #tpu.pipeline_mode<synchronous>, transform_indices = @transform_2, window_bounds = array<i64: 64, 1>}, {transform_indices = @transform_3, window_bounds = array<i64: 1, 64, 9>}]} {
    %c0 = arith.constant 0 : index
    %c0_0 = arith.constant 0 : index
    %c0_1 = arith.constant 0 : index
    %0 = vector.load %arg1[%c0, %c0_0, %c0_1] : memref<1x512x9xbf16, #tpu.memory_space<vmem>>, vector<1x512x9xbf16>
    %1 = vector.shape_cast %0 : vector<1x512x9xbf16> to vector<512x9xbf16>
    %c0_2 = arith.constant 0 : index
    %c0_3 = arith.constant 0 : index
    %2 = vector.load %arg2[%c0_2, %c0_3] : memref<64x512xbf16, #tpu.memory_space<vmem>>, vector<64x512xbf16>
    %cst = arith.constant dense<0.000000e+00> : vector<64x9xf32>
    %3 = tpu.matmul %2, %1, %cst {dimension_numbers = #tpu.dot_dimension_numbers<[1], [0], [0], [1], [0, 0, 1, 1], [], []>} : vector<64x512xbf16>, vector<512x9xbf16>, vector<64x9xf32> -> vector<64x9xf32>
    %c0_4 = arith.constant 0 : index
    %c0_5 = arith.constant 0 : index
    %4 = vector.load %arg3[%c0_4, %c0_5] : memref<64x1xf32, #tpu.memory_space<vmem>>, vector<64x1xf32>
    %5 = vector.broadcast %4 : vector<64x1xf32> to vector<64x9xf32>
    %6 = arith.addf %3, %5 : vector<64x9xf32>
    %cst_6 = arith.constant dense<0.000000e+00> : vector<64xf32>
    %7 = vector.multi_reduction <add>, %6, %cst_6 [1] : vector<64x9xf32> to vector<64xf32>
    %8 = vector.shape_cast %7 : vector<64xf32> to vector<64x1xf32>
    %9 = arith.mulf %6, %6 : vector<64x9xf32>
    %cst_7 = arith.constant dense<0.000000e+00> : vector<64xf32>
    %10 = vector.multi_reduction <add>, %9, %cst_7 [1] : vector<64x9xf32> to vector<64xf32>
    %11 = vector.shape_cast %10 : vector<64xf32> to vector<64x1xf32>
    %cst_8 = arith.constant 0.111111112 : f32
    %12 = vector.broadcast %cst_8 : f32 to vector<64x1xf32>
    %13 = arith.mulf %8, %12 : vector<64x1xf32>
    %cst_9 = arith.constant 0.111111112 : f32
    %14 = vector.broadcast %cst_9 : f32 to vector<64x1xf32>
    %15 = arith.mulf %11, %14 : vector<64x1xf32>
    %16 = arith.mulf %13, %13 : vector<64x1xf32>
    %17 = arith.subf %15, %16 : vector<64x1xf32>
    %18 = vector.broadcast %13 : vector<64x1xf32> to vector<64x9xf32>
    %19 = arith.subf %6, %18 : vector<64x9xf32>
    %cst_10 = arith.constant 9.99999974E-6 : f32
    %20 = vector.broadcast %cst_10 : f32 to vector<64x1xf32>
    %21 = arith.addf %17, %20 : vector<64x1xf32>
    %22 = math.rsqrt %21 : vector<64x1xf32>
    %23 = vector.broadcast %22 : vector<64x1xf32> to vector<64x9xf32>
    %24 = arith.mulf %19, %23 : vector<64x9xf32>
    %cst_11 = arith.constant 0.000000e+00 : f32
    %25 = vector.broadcast %cst_11 : f32 to vector<64x9xf32>
    %26 = arith.cmpf oge, %24, %25 : vector<64x9xf32>
    %cst_12 = arith.constant 2.000000e-01 : f32
    %27 = vector.broadcast %cst_12 : f32 to vector<64x9xf32>
    %28 = arith.mulf %27, %24 : vector<64x9xf32>
    %29 = arith.select %26, %24, %28 : vector<64x9xi1>, vector<64x9xf32>
    %c0_13 = arith.constant 0 : index
    %c0_14 = arith.constant 0 : index
    %c0_15 = arith.constant 0 : index
    %30 = vector.load %arg4[%c0_13, %c0_14, %c0_15] : memref<1x64x9xf32, #tpu.memory_space<vmem>>, vector<1x64x9xf32>
    %31 = vector.shape_cast %30 : vector<1x64x9xf32> to vector<64x9xf32>
    %32 = vector.shape_cast %29 : vector<64x9xf32> to vector<1x64x9xf32>
    tpu.vector_store %arg4[%c0_13, %c0_14, %c0_15], %32 {strides = array<i32>} : memref<1x64x9xf32, #tpu.memory_space<vmem>>, vector<1x64x9xf32>,
    return
  }
  func.func @transform_0(%arg0: i32) -> (i32, i32, i32) {
    %c0_i32 = arith.constant 0 : i32
    %c0_i32_0 = arith.constant 0 : i32
    %c0_i32_1 = arith.constant 0 : i32
    return %arg0, %c0_i32, %c0_i32_0 : i32, i32, i32
  }
  func.func @transform_1(%arg0: i32) -> (i32, i32) {
    %c0_i32 = arith.constant 0 : i32
    %c0_i32_0 = arith.constant 0 : i32
    %c0_i32_1 = arith.constant 0 : i32
    return %c0_i32, %c0_i32_0 : i32, i32
  }
  func.func @transform_2(%arg0: i32) -> (i32, i32) {
    %c0_i32 = arith.constant 0 : i32
    %c0_i32_0 = arith.constant 0 : i32
    %c0_i32_1 = arith.constant 0 : i32
    return %c0_i32, %c0_i32_0 : i32, i32
  }
  func.func @transform_3(%arg0: i32) -> (i32, i32, i32) {
    %c0_i32 = arith.constant 0 : i32
    %c0_i32_0 = arith.constant 0 : i32
    %c0_i32_1 = arith.constant 0 : i32
    return %arg0, %c0_i32, %c0_i32_0 : i32, i32, i32
  }
}

module attributes {stable_mosaic.version = 11 : i64} {
  func.func @_conv_block_kernel(%arg0: i32, %arg1: memref<1x1024x4xbf16, #tpu.memory_space<vmem>>, %arg2: memref<1x1024xbf16, #tpu.memory_space<vmem>>, %arg3: memref<1x1xf32, #tpu.memory_space<vmem>>, %arg4: memref<1x1x4xf32, #tpu.memory_space<vmem>>) attributes {dimension_semantics = [#tpu.dimension_semantics<parallel>], iteration_bounds = array<i64: 2>, scalar_prefetch = 0 : i64, scratch_operands = 0 : i64, tpu.core_type = #tpu.core_type<tc>, window_params = [{transform_indices = @transform_0, window_bounds = array<i64: 1, 1024, 4>}, {pipeline_mode = #tpu.pipeline_mode<synchronous>, transform_indices = @transform_1, window_bounds = array<i64: 1, 1024>}, {pipeline_mode = #tpu.pipeline_mode<synchronous>, transform_indices = @transform_2, window_bounds = array<i64: 1, 1>}, {transform_indices = @transform_3, window_bounds = array<i64: 1, 1, 4>}]} {
    %c0 = arith.constant 0 : index
    %c0_0 = arith.constant 0 : index
    %c0_1 = arith.constant 0 : index
    %0 = vector.load %arg1[%c0, %c0_0, %c0_1] : memref<1x1024x4xbf16, #tpu.memory_space<vmem>>, vector<1x1024x4xbf16>
    %1 = vector.shape_cast %0 : vector<1x1024x4xbf16> to vector<1024x4xbf16>
    %c0_2 = arith.constant 0 : index
    %c0_3 = arith.constant 0 : index
    %2 = vector.load %arg2[%c0_2, %c0_3] : memref<1x1024xbf16, #tpu.memory_space<vmem>>, vector<1x1024xbf16>
    %cst = arith.constant dense<0.000000e+00> : vector<1x4xf32>
    %3 = tpu.matmul %2, %1, %cst {dimension_numbers = #tpu.dot_dimension_numbers<[1], [0], [0], [1], [0, 0, 1, 1], [], []>} : vector<1x1024xbf16>, vector<1024x4xbf16>, vector<1x4xf32> -> vector<1x4xf32>
    %c0_4 = arith.constant 0 : index
    %c0_5 = arith.constant 0 : index
    %4 = vector.load %arg3[%c0_4, %c0_5] : memref<1x1xf32, #tpu.memory_space<vmem>>, vector<1x1xf32>
    %5 = vector.broadcast %4 : vector<1x1xf32> to vector<1x4xf32>
    %6 = arith.addf %3, %5 : vector<1x4xf32>
    %c0_6 = arith.constant 0 : index
    %c0_7 = arith.constant 0 : index
    %c0_8 = arith.constant 0 : index
    %7 = vector.load %arg4[%c0_6, %c0_7, %c0_8] : memref<1x1x4xf32, #tpu.memory_space<vmem>>, vector<1x1x4xf32>
    %8 = vector.shape_cast %7 : vector<1x1x4xf32> to vector<1x4xf32>
    %9 = vector.shape_cast %6 : vector<1x4xf32> to vector<1x1x4xf32>
    tpu.vector_store %arg4[%c0_6, %c0_7, %c0_8], %9 {strides = array<i32>} : memref<1x1x4xf32, #tpu.memory_space<vmem>>, vector<1x1x4xf32>,
    return
  }
  func.func @transform_0(%arg0: i32) -> (i32, i32, i32) {
    %c0_i32 = arith.constant 0 : i32
    %c0_i32_0 = arith.constant 0 : i32
    %c0_i32_1 = arith.constant 0 : i32
    return %arg0, %c0_i32, %c0_i32_0 : i32, i32, i32
  }
  func.func @transform_1(%arg0: i32) -> (i32, i32) {
    %c0_i32 = arith.constant 0 : i32
    %c0_i32_0 = arith.constant 0 : i32
    %c0_i32_1 = arith.constant 0 : i32
    return %c0_i32, %c0_i32_0 : i32, i32
  }
  func.func @transform_2(%arg0: i32) -> (i32, i32) {
    %c0_i32 = arith.constant 0 : i32
    %c0_i32_0 = arith.constant 0 : i32
    %c0_i32_1 = arith.constant 0 : i32
    return %c0_i32, %c0_i32_0 : i32, i32
  }
  func.func @transform_3(%arg0: i32) -> (i32, i32, i32) {
    %c0_i32 = arith.constant 0 : i32
    %c0_i32_0 = arith.constant 0 : i32
    %c0_i32_1 = arith.constant 0 : i32
    return %arg0, %c0_i32, %c0_i32_0 : i32, i32, i32
  }
}

</mosaic_0001>

<bundles_post_ra>
// kernel: patch_discriminator_forward.5
= control target key start
LH: loop header
LB: loop body
LE: loop exit
PB: predicated region body
PF: predicated region fallthrough
CT: control target
= control target key end

     0   :  { %s414_s12 = smov 0   ;;  %s441_s0 = inlined_call_operand.vmem [shape: bf16[2,64,256], index: 0, kind: input, shape index: {}]   ;;  %s442_s1 = inlined_call_operand.vmem [shape: bf16[8,64], index: 1, kind: input, shape index: {}]   ;;  %s443_s2 = inlined_call_operand.vmem [shape: f32[8,1], index: 2, kind: input, shape index: {}]   ;;  %s444_s3 = inlined_call_operand.vmem [shape: f32[2,8,256], index: 3, kind: output, shape index: {}]  }
   0x1 LB: > { %s320_s13 = sadd.s32 4294967295, %s391_s12   ;;  %p324_p0 = scmp.ge.s32.totalorder %s391_s12, 1  ;;  %s391_s12 = sphi %s414_s12, %s13_s12  }
   0x2   : > { %p137_p1 = scmp.lt.s32.totalorder %s391_s12, 3 }
   0x4   : > { %p138_p2 = pnand %p324_p0, %p137_p1 }
   0x5   : > { %p161_p3 = scmp.lt.s32.totalorder (!%p138_p2), %s320_s13, 1 }
   0x6   : > { %141 = sbr.rel (%p138_p2) target bundleno = 167 (0xa7), region = 32 }
   0xb   : > { %v181_v0 = vld [vmem:[%s443_s2] sm:$0xff]  ;;  %v393_v1 = vmov 0   ;;  %s446_s13 = smov (!%p161_p3, %s320_s13), 1  ;;  %vm227_vm0 = vcmask 523264  }
   0xc   : > { %384 = vset.pattern.permute.xlu0 %v393_v1  ;;  %s365_s16 = sshll.u32 %s446_s13, 6  ;;  %v180_v26 = vld [vmem:[%s442_s1] sm:$0xf]  ;;  %s366_s22 = sshll.u32 %s446_s13, 4 }
   0xd   : > { %184 = vperm.xlu0 %384, %v181_v0   ;;  %s165_s19 = scalar_lea.vmem %s441_s0, %s365_s16  ;;  %s170_s25 = scalar_lea.vmem %s444_s3, %s366_s22 }
   0xe   : > { %v355_v2 = vld [vmem:[%s165_s19 + $0x30] sm:$0xf]  ;;  %v374_v3 = vld [vmem:[%s165_s19 + $0x34] sm:$0xf0]  ;;  %v373_v4 = vld [vmem:[%s165_s19 + $0x34] sm:$0xf] }
   0xf   : > { %v356_v5 = vor.u32 %v374_v3, %v355_v2  ;;  %v357_v6 = vld [vmem:[%s165_s19 + $0x38] sm:$0xf0]  ;;  %v347_v7 = vld [vmem:[%s165_s19 + $0x20] sm:$0xf]  ;;  %v372_v8 = vld [vmem:[%s165_s19 + $0x24] sm:$0xf0] }
  0x10   : > { %v360_v9 = vor.u32 %v373_v4, %v357_v6  ;;  %v371_v10 = vld [vmem:[%s165_s19 + $0x24] sm:$0xf]  ;;  %v349_v11 = vld [vmem:[%s165_s19 + $0x28] sm:$0xf0]  ;;  %v348_v12 = vor.u32 %v372_v8, %v347_v7  ;;  %v339_v14 = vld [vmem:[%s165_s19 + $0x10] sm:$0xf] }
  0x11   : > { %235 = vmatpush.bf16.msra.mxu0 %v356_v5  ;;  %v352_v13 = vor.u32 %v371_v10, %v349_v11  ;;  %v370_v15 = vld [vmem:[%s165_s19 + $0x14] sm:$0xf0]  ;;  %v369_v16 = vld [vmem:[%s165_s19 + $0x14] sm:$0xf]  ;;  %v341_v17 = vld [vmem:[%s165_s19 + $0x18] sm:$0xf0] }
  0x12   : > { %248 = vmatpush.bf16.msra.mxu1 %v360_v9  ;;  %v340_v18 = vor.u32 %v370_v15, %v339_v14  ;;  %v344_v19 = vor.u32 %v369_v16, %v341_v17  ;;  %v331_v20 = vld [vmem:[%s165_s19] sm:$0xf]  ;;  %v368_v21 = vld [vmem:[%s165_s19 + $0x4] sm:$0xf0]  ;;  %v367_v22 = vld [vmem:[%s165_s19 + $0x4] sm:$0xf] }
  0x13   : > { %v333_v23 = vld [vmem:[%s165_s19 + $0x8] sm:$0xf0]  ;;  %v332_v24 = vor.u32 %v368_v21, %v331_v20 }
  0x14   : > { %v336_v25 = vor.u32 %v367_v22, %v333_v23 }
  0x15   : > { %236 = vmatpush.bf16.msra.mxu0 %v348_v12 }
  0x16   : > { %249 = vmatpush.bf16.msra.mxu1 %v352_v13 }
  0x19   : > { %237 = vmatpush.bf16.msra.mxu0 %v340_v18 }
  0x1a   : > { %250 = vmatpush.bf16.msra.mxu1 %v344_v19 }
  0x1d   : > { %238 = vmatpush.bf16.msra.mxu0 %v332_v24 }
  0x1e   : > { %251 = vmatpush.bf16.msra.mxu1 %v336_v25 }
  0x20   : > { %361 = vmatmul.msk.bf16.vlgmr.msra.gmra.mxu0 %vm227_vm0, %v180_v26 }
  0x21   : > { %362 = vmatmul.msk.bf16.vlgmr.msra.gmra.mxu1 %vm227_vm0, %v180_v26 }
  0x7f   : > { %v185_v27 = vpop.permute.xlu0 %184 }
  0x9d   : > { %v240_v28 = vpop.f32.mrf.mxu0 }
  0x9e   : > { %v241_v29 = vadd.f32 %v240_v28, %v185_v27  ;;  %v253_v30 = vpop.f32.mrf.mxu1 }
  0x9f   : > { %v254_v31 = vadd.f32 %v253_v30, %v185_v27 }
  0xa0   : > { %vm257_vm1 = vcmp.ge.f32.partialorder %v241_v29, 0.0  ;;  %v259_v32 = vmul.f32 0.2, %v241_v29 }
  0xa1   : > { %vm258_vm2 = vcmp.ge.f32.partialorder %v254_v31, 0.0  ;;  %v260_v33 = vmul.f32 0.2, %v254_v31 }
  0xa2   : > { %v261_v34 = vsel %vm257_vm1, %v241_v29, %v259_v32 }
  0xa3   : > { %263 = vst [vmem:[%s170_s25] sm:$0xff] %v261_v34  ;;  %v262_v35 = vsel %vm258_vm2, %v254_v31, %v260_v33 }
  0xa4   : > { %264 = vst [vmem:[%s170_s25 + $0x8] sm:$0xff] %v262_v35 }
  0xa5   : > { %v242_v36 = vpop.f32.mrf.mxu0 }
  0xa6   : > { %v255_v37 = vpop.f32.mrf.mxu1 }
  0xa7 PF: > { %s13_s12 = sadd.s32 1, %s391_s12  }
  0xa8   : > { %p10_p4 = scmp.ge.s32.totalorder %s13_s12, 4  }
  0xaa   :  { %12 = sbr.rel (!%p10_p4) target bundleno = 1 (0x1), region = 62 }

// kernel: patch_discriminator_forward.6
= control target key start
LH: loop header
LB: loop body
LE: loop exit
PB: predicated region body
PF: predicated region fallthrough
CT: control target
= control target key end

     0   :  { %s482_s12 = smov 0   ;;  %s518_s0 = inlined_call_operand.vmem [shape: bf16[2,128,64], index: 0, kind: input, shape index: {}]   ;;  %s519_s1 = inlined_call_operand.vmem [shape: bf16[16,128], index: 1, kind: input, shape index: {}]   ;;  %s520_s2 = inlined_call_operand.vmem [shape: f32[16,1], index: 2, kind: input, shape index: {}]   ;;  %s521_s3 = inlined_call_operand.vmem [shape: f32[2,16,64], index: 3, kind: output, shape index: {}]  }
   0x1 LB: > { %s381_s13 = sadd.s32 4294967295, %s459_s12   ;;  %p385_p0 = scmp.ge.s32.totalorder %s459_s12, 1  ;;  %s459_s12 = sphi %s482_s12, %s13_s12  }
   0x2   : > { %p137_p1 = scmp.lt.s32.totalorder %s459_s12, 3 }
   0x4   : > { %p138_p2 = pnand %p385_p0, %p137_p1 }
   0x5   : > { %p161_p3 = scmp.lt.s32.totalorder (!%p138_p2), %s381_s13, 1 }
   0x6   : > { %141 = sbr.rel (%p138_p2) target bundleno = 331 (0x14b), region = 32 }
   0xb   : > { %s523_s13 = smov (!%p161_p3, %s381_s13), 1  ;;  %v461_v2 = vmov 0   ;;  %v189_v3 = vld [vmem:[%s520_s2] sm:$0xff]  ;;  %v190_v5 = vld [vmem:[%s520_s2 + $0x8] sm:$0xff]  ;;  %vm269_vm0 = vcmask 523264  }
   0xc   : > { %s428_s14 = sshll.u32 %s523_s13, 6  ;;  %448 = vset.pattern.permute.xlu0 %v461_v2  ;;  %v438_v11 = vld [vmem:[%s519_s1] sm:$0xff]  ;;  %s429_s24 = sshll.u32 %s523_s13, 4 }
   0xd   : > { %s165_s17 = scalar_lea.vmem %s518_s0, %s428_s14  ;;  %193 = vperm.xlu0 %448, %v189_v3   ;;  %s170_s27 = scalar_lea.vmem %s521_s3, %s429_s24 }
   0xe   : > { %v437_v0 = vld [vmem:[%s165_s17 + $0x38] sm:$0xff]  ;;  %v436_v1 = vld [vmem:[%s165_s17 + $0x30] sm:$0xff]  ;;  %v435_v4 = vld [vmem:[%s165_s17 + $0x28] sm:$0xff] }
   0xf   : > { %255 = vmatpush.bf16.msra.mxu0 %v437_v0  ;;  %v434_v6 = vld [vmem:[%s165_s17 + $0x20] sm:$0xff]  ;;  %v433_v7 = vld [vmem:[%s165_s17 + $0x18] sm:$0xff]  ;;  %v432_v8 = vld [vmem:[%s165_s17 + $0x10] sm:$0xff] }
  0x10   : > { %v431_v9 = vld [vmem:[%s165_s17 + $0x8] sm:$0xff]  ;;  %v430_v10 = vld [vmem:[%s165_s17] sm:$0xff] }
  0x13   : > { %256 = vmatpush.bf16.msra.mxu0 %v436_v1 }
  0x15   : > { %198 = vperm.xlu0 %448, %v190_v5  }
  0x17   : > { %257 = vmatpush.bf16.msra.mxu0 %v435_v4 }
  0x1b   : > { %258 = vmatpush.bf16.msra.mxu0 %v434_v6 }
  0x1f   : > { %259 = vmatpush.bf16.msra.mxu0 %v433_v7 }
  0x23   : > { %260 = vmatpush.bf16.msra.mxu0 %v432_v8 }
  0x27   : > { %261 = vmatpush.bf16.msra.mxu0 %v431_v9 }
  0x2b   : > { %262 = vmatpush.bf16.msra.mxu0 %v430_v10 }
  0x2e   : > { %263 = vmatmul.bf16.vlgmr.msra.gmra.mxu0 %v438_v11 }
  0x7f   : > { %v194_v12 = vpop.permute.xlu0 %193 }
  0x87   : > { %v199_v18 = vpop.permute.xlu0 %198 }
  0xab   : > { %v264_v13 = vpop.f32.mrf.mxu0 }
  0xac   : > { %v265_v14 = vadd.f32 %v264_v13, %v194_v12 }
  0xae   : > { %v270_v15 = vsel %vm269_vm0, %v265_v14, 0.0  ;;  %v276_v16 = vmul.f32 %v265_v14, %v265_v14 }
  0xaf   : > { %271 = vadd.xlane.f32.xlu1 %v270_v15 }
  0xb0   : > { %v278_v17 = vsel %vm269_vm0, %v276_v16, 0.0 }
  0xb1   : > { %279 = vadd.xlane.f32.xlu2 %v278_v17 }
  0xb3   : > { %v266_v19 = vpop.f32.mrf.mxu0 }
  0xb4   : > { %v267_v20 = vadd.f32 %v266_v19, %v199_v18 }
  0xb6   : > { %v273_v21 = vsel %vm269_vm0, %v267_v20, 0.0  ;;  %v277_v22 = vmul.f32 %v267_v20, %v267_v20 }
  0xb7   : > { %274 = vadd.xlane.f32.xlu1 %v273_v21 }
  0xb8   : > { %v281_v23 = vsel %vm269_vm0, %v277_v22, 0.0 }
  0xb9   : > { %282 = vadd.xlane.f32.xlu2 %v281_v23 }
 0x122   : > { %v272_v24 = vpop.xlane.xlu1 %271 }
 0x123   : > { %v284_v25 = vmul.f32 0.015625, %v272_v24 }
 0x124   : > { %v280_v26 = vpop.xlane.xlu2 %279 }
 0x125   : > { %v288_v27 = vmul.f32 %v284_v25, %v284_v25  ;;  %v286_v28 = vmul.f32 0.015625, %v280_v26  ;;  %v292_v46 = vsub.f32 %v265_v14, %v284_v25 }
 0x127   : > { %v290_v29 = vsub.f32 %v286_v28, %v288_v27 }
 0x129   : > { %v294_v30 = vadd.f32 1e-05, %v290_v29 }
 0x12a   : > { %v275_v31 = vpop.xlane.xlu1 %274 }
 0x12b   : > { %449 = vrsqrt.f32 %v294_v30  ;;  %v285_v32 = vmul.f32 0.015625, %v275_v31  ;;  %vm302_vm2 = vweird.f32 %v294_v30 }
 0x12c   : > { %v283_v33 = vpop.xlane.xlu2 %282 }
 0x12d   : > { %v289_v34 = vmul.f32 %v285_v32, %v285_v32  ;;  %v287_v35 = vmul.f32 0.015625, %v283_v33  ;;  %v293_v55 = vsub.f32 %v267_v20, %v285_v32 }
 0x12f   : > { %v291_v36 = vsub.f32 %v287_v35, %v289_v34 }
 0x131   : > { %v450_v37 = vpop.eup %449  ;;  %v295_v38 = vadd.f32 1e-05, %v291_v36 }
 0x132   : > { %v297_v39 = vmul.f32 %v450_v37, %v294_v30  ;;  %vm303_vm1 = vweird.f32 %v450_v37 }
 0x133   : > { %451 = vrsqrt.f32 %v295_v38  ;;  %vm304_vm3 = vmor %vm302_vm2, %vm303_vm1  ;;  %vm312_vm6 = vweird.f32 %v295_v38 }
 0x134   : > { %v298_v40 = vmul.f32 %v450_v37, %v297_v39 }
 0x136   : > { %v299_v41 = vmul.f32 0.5, %v298_v40 }
 0x138   : > { %v300_v42 = vsub.f32 1.5, %v299_v41 }
 0x139   : > { %v452_v43 = vpop.eup %451 }
 0x13a   : > { %v301_v44 = vmul.f32 %v450_v37, %v300_v42  ;;  %v307_v45 = vmul.f32 %v452_v43, %v295_v38  ;;  %vm313_vm5 = vweird.f32 %v452_v43 }
 0x13b   : > { %vm314_vm7 = vmor %vm312_vm6, %vm313_vm5 }
 0x13c   : > { %v305_v47 = vsel %vm304_vm3, %v450_v37, %v301_v44  ;;  %v308_v48 = vmul.f32 %v452_v43, %v307_v45 }
 0x13d   : > { %v316_v49 = vmul.f32 %v305_v47, %v292_v46 }
 0x13e   : > { %v309_v50 = vmul.f32 0.5, %v308_v48 }
 0x13f   : > { %vm318_vm4 = vcmp.ge.f32.partialorder %v316_v49, 0.0  ;;  %v320_v51 = vmul.f32 0.2, %v316_v49 }
 0x140   : > { %v310_v52 = vsub.f32 1.5, %v309_v50 }
 0x141   : > { %v322_v53 = vsel %vm318_vm4, %v316_v49, %v320_v51 }
 0x142   : > { %324 = vst.msk [vmem:[%s170_s27] sm:$0xff] %vm269_vm0, %v322_v53  ;;  %v311_v54 = vmul.f32 %v452_v43, %v310_v52 }
 0x144   : > { %v315_v56 = vsel %vm314_vm7, %v452_v43, %v311_v54 }
 0x145   : > { %v317_v57 = vmul.f32 %v315_v56, %v293_v55 }
 0x147   : > { %vm319_vm8 = vcmp.ge.f32.partialorder %v317_v57, 0.0  ;;  %v321_v58 = vmul.f32 0.2, %v317_v57 }
 0x149   : > { %v323_v59 = vsel %vm319_vm8, %v317_v57, %v321_v58 }
 0x14a   : > { %325 = vst.msk [vmem:[%s170_s27 + $0x8] sm:$0xff] %vm269_vm0, %v323_v59 }
 0x14b PF: > { %s13_s12 = sadd.s32 1, %s459_s12  }
 0x14c   : > { %p10_p4 = scmp.ge.s32.totalorder %s13_s12, 4  }
 0x14e   :  { %12 = sbr.rel (!%p10_p4) target bundleno = 1 (0x1), region = 62 }

// kernel: patch_discriminator_forward.7
= control target key start
LH: loop header
LB: loop body
LE: loop exit
PB: predicated region body
PF: predicated region fallthrough
CT: control target
= control target key end

     0   :  { %s730_s12 = smov 0   ;;  %s852_s0 = inlined_call_operand.vmem [shape: bf16[2,256,16], index: 0, kind: input, shape index: {}]   ;;  %s853_s1 = inlined_call_operand.vmem [shape: bf16[32,256], index: 1, kind: input, shape index: {}]   ;;  %s854_s2 = inlined_call_operand.vmem [shape: f32[32,1], index: 2, kind: input, shape index: {}]   ;;  %s855_s3 = inlined_call_operand.vmem [shape: f32[2,32,16], index: 3, kind: output, shape index: {}]  }
   0x1 LB: > { %s553_s13 = sadd.s32 4294967295, %s707_s12   ;;  %p557_p0 = scmp.ge.s32.totalorder %s707_s12, 1  ;;  %s707_s12 = sphi %s730_s12, %s13_s12  }
   0x2   : > { %p137_p1 = scmp.lt.s32.totalorder %s707_s12, 3 }
   0x4   : > { %p138_p2 = pnand %p557_p0, %p137_p1 }
   0x5   : > { %p161_p3 = scmp.lt.s32.totalorder (!%p138_p2), %s553_s13, 1 }
   0x6   : > { %141 = sbr.rel (%p138_p2) target bundleno = 363 (0x16b), region = 32 }
   0xb   : > { %s857_s13 = smov (!%p161_p3, %s553_s13), 1  ;;  %v709_v4 = vmov 0   ;;  %v207_v7 = vld [vmem:[%s854_s2] sm:$0xff]  ;;  %v209_v8 = vld [vmem:[%s854_s2 + $0x10] sm:$0xff]  ;;  %v208_v11 = vld [vmem:[%s854_s2 + $0x8] sm:$0xff]  ;;  %vm385_vm0 = vcmask 130048  }
   0xc   : > { %s644_s14 = sshll.u32 %s857_s13, 7  ;;  %691 = vset.pattern.permute.xlu0 %v709_v4  ;;  %692 = vset.pattern.permute.xlu1 %v709_v4  ;;  %v210_v12 = vld [vmem:[%s854_s2 + $0x18] sm:$0xff]  ;;  %v564_v19 = vld [vmem:[%s853_s1] sm:$0xf]  ;;  %v663_v21 = vld [vmem:[%s853_s1 + $0x4] sm:$0xf0] }
   0xd   : > { %s744_s17 = scalar_lea.vmem %s852_s0, %s644_s14  ;;  %213 = vperm.xlu0 %691, %v207_v7   ;;  %223 = vperm.xlu1 %692, %v209_v8   ;;  %v572_v22 = vld [vmem:[%s853_s1 + $0x10] sm:$0xf]  ;;  %v665_v24 = vld [vmem:[%s853_s1 + $0x14] sm:$0xf0]  ;;  %v662_v25 = vld [vmem:[%s853_s1 + $0x4] sm:$0xf]  ;;  %v565_v29 = vor.u32 %v663_v21, %v564_v19 }
   0xe   : > { %v653_v0 = vld [vmem:[%s744_s17 + $0x38] sm:$0xff]  ;;  %v652_v2 = vld [vmem:[%s744_s17 + $0x30] sm:$0xff]  ;;  %v651_v5 = vld [vmem:[%s744_s17 + $0x28] sm:$0xff]  ;;  %v573_v30 = vor.u32 %v665_v24, %v572_v22 }
   0xf   : > { %v661_v1 = vld [vmem:[%s744_s17 + $0x78] sm:$0xff]  ;;  %347 = vmatpush.bf16.msra.mxu0 %v653_v0  ;;  %666 = vmatpush.bf16.msra.mxu2 %v653_v0  ;;  %v660_v3 = vld [vmem:[%s744_s17 + $0x70] sm:$0xff]  ;;  %v659_v6 = vld [vmem:[%s744_s17 + $0x68] sm:$0xff] }
  0x10   : > { %366 = vmatpush.bf16.msra.mxu1 %v661_v1  ;;  %674 = vmatpush.bf16.msra.mxu3 %v661_v1  ;;  %v650_v9 = vld [vmem:[%s744_s17 + $0x20] sm:$0xff]  ;;  %v649_v13 = vld [vmem:[%s744_s17 + $0x18] sm:$0xff]  ;;  %v648_v15 = vld [vmem:[%s744_s17 + $0x10] sm:$0xff] }
  0x11   : > { %v658_v10 = vld [vmem:[%s744_s17 + $0x60] sm:$0xff]  ;;  %v657_v14 = vld [vmem:[%s744_s17 + $0x58] sm:$0xff]  ;;  %v656_v16 = vld [vmem:[%s744_s17 + $0x50] sm:$0xff] }
  0x12   : > { %v647_v17 = vld [vmem:[%s744_s17 + $0x8] sm:$0xff]  ;;  %v646_v20 = vld [vmem:[%s744_s17] sm:$0xff]  ;;  %v664_v27 = vld [vmem:[%s853_s1 + $0x14] sm:$0xf] }
  0x13   : > { %348 = vmatpush.bf16.msra.mxu0 %v652_v2  ;;  %667 = vmatpush.bf16.msra.mxu2 %v652_v2  ;;  %v655_v18 = vld [vmem:[%s744_s17 + $0x48] sm:$0xff]  ;;  %v654_v23 = vld [vmem:[%s744_s17 + $0x40] sm:$0xff]  ;;  %v574_v28 = vld [vmem:[%s853_s1 + $0x18] sm:$0xf0]  ;;  %s645_s17 = sshll.u32 %s857_s13, 5 }
  0x14   : > { %367 = vmatpush.bf16.msra.mxu1 %v660_v3  ;;  %675 = vmatpush.bf16.msra.mxu3 %v660_v3  ;;  %v566_v26 = vld [vmem:[%s853_s1 + $0x8] sm:$0xf0]  ;;  %v577_v32 = vor.u32 %v664_v27, %v574_v28  ;;  %s835_s20 = scalar_lea.vmem %s855_s3, %s645_s17 }
  0x15   : > { %218 = vperm.xlu0 %691, %v208_v11   ;;  %228 = vperm.xlu1 %692, %v210_v12   ;;  %v569_v31 = vor.u32 %v662_v25, %v566_v26 }
  0x17   : > { %349 = vmatpush.bf16.msra.mxu0 %v651_v5  ;;  %668 = vmatpush.bf16.msra.mxu2 %v651_v5 }
  0x18   : > { %368 = vmatpush.bf16.msra.mxu1 %v659_v6  ;;  %676 = vmatpush.bf16.msra.mxu3 %v659_v6 }
  0x1b   : > { %350 = vmatpush.bf16.msra.mxu0 %v650_v9  ;;  %669 = vmatpush.bf16.msra.mxu2 %v650_v9 }
  0x1c   : > { %369 = vmatpush.bf16.msra.mxu1 %v658_v10  ;;  %677 = vmatpush.bf16.msra.mxu3 %v658_v10 }
  0x1f   : > { %351 = vmatpush.bf16.msra.mxu0 %v649_v13  ;;  %670 = vmatpush.bf16.msra.mxu2 %v649_v13 }
  0x20   : > { %370 = vmatpush.bf16.msra.mxu1 %v657_v14  ;;  %678 = vmatpush.bf16.msra.mxu3 %v657_v14 }
  0x23   : > { %352 = vmatpush.bf16.msra.mxu0 %v648_v15  ;;  %671 = vmatpush.bf16.msra.mxu2 %v648_v15 }
  0x24   : > { %371 = vmatpush.bf16.msra.mxu1 %v656_v16  ;;  %679 = vmatpush.bf16.msra.mxu3 %v656_v16 }
  0x27   : > { %353 = vmatpush.bf16.msra.mxu0 %v647_v17  ;;  %672 = vmatpush.bf16.msra.mxu2 %v647_v17 }
  0x28   : > { %372 = vmatpush.bf16.msra.mxu1 %v655_v18  ;;  %680 = vmatpush.bf16.msra.mxu3 %v655_v18 }
  0x2b   : > { %354 = vmatpush.bf16.msra.mxu0 %v646_v20  ;;  %673 = vmatpush.bf16.msra.mxu2 %v646_v20 }
  0x2c   : > { %373 = vmatpush.bf16.msra.mxu1 %v654_v23  ;;  %681 = vmatpush.bf16.msra.mxu3 %v654_v23 }
  0x2e   : > { %355 = vmatmul.bf16.vlgmr.msra.gmra.mxu0 %v565_v29  ;;  %360 = vmatmul.bf16.vlgmr.msra.gmra.mxu2 %v573_v30 }
  0x2f   : > { %374 = vmatmul.bf16.vlgmr.msra.gmra.mxu1 %v569_v31  ;;  %379 = vmatmul.bf16.vlgmr.msra.gmra.mxu3 %v577_v32 }
  0x7f   : > { %v214_v33 = vpop.permute.xlu0 %213  ;;  %v224_v37 = vpop.permute.xlu1 %223 }
  0x87   : > { %v219_v43 = vpop.permute.xlu0 %218  ;;  %v229_v50 = vpop.permute.xlu1 %228 }
  0xab   : > { %v356_v34 = vpop.f32.mrf.mxu0 }
  0xac   : > { %v357_v35 = vadd.f32 %v356_v34, %v214_v33  ;;  %v375_v36 = vpop.f32.mrf.mxu1 }
  0xae   : > { %v798_v38 = vadd.f32 %v375_v36, %v357_v35 }
  0xb0   : > { %v386_v39 = vsel %vm385_vm0, %v798_v38, 0.0  ;;  %v398_v56 = vmul.f32 %v798_v38, %v798_v38 }
  0xb1   : > { %v361_v40 = vpop.f32.mrf.mxu2  ;;  %387 = vadd.xlane.f32.xlu2 %v386_v39 }
  0xb2   : > { %v362_v41 = vadd.f32 %v361_v40, %v224_v37  ;;  %v380_v42 = vpop.f32.mrf.mxu3  ;;  %v402_v58 = vsel %vm385_vm0, %v398_v56, 0.0 }
  0xb3   : > { %v358_v44 = vpop.f32.mrf.mxu0 }
  0xb4   : > { %v359_v45 = vadd.f32 %v358_v44, %v219_v43  ;;  %v802_v46 = vadd.f32 %v380_v42, %v362_v41  ;;  %v377_v47 = vpop.f32.mrf.mxu1 }
  0xb6   : > { %v804_v48 = vadd.f32 %v377_v47, %v359_v45  ;;  %v392_v49 = vsel %vm385_vm0, %v802_v46, 0.0  ;;  %v400_v61 = vmul.f32 %v802_v46, %v802_v46 }
  0xb7   : > { %393 = vadd.xlane.f32.xlu0 %v392_v49 }
  0xb8   : > { %v389_v51 = vsel %vm385_vm0, %v804_v48, 0.0  ;;  %v399_v59 = vmul.f32 %v804_v48, %v804_v48  ;;  %v408_v62 = vsel %vm385_vm0, %v400_v61, 0.0 }
  0xb9   : > { %v363_v52 = vpop.f32.mrf.mxu2  ;;  %390 = vadd.xlane.f32.xlu2 %v389_v51 }
  0xba   : > { %v364_v53 = vadd.f32 %v363_v52, %v229_v50  ;;  %v382_v54 = vpop.f32.mrf.mxu3  ;;  %v405_v60 = vsel %vm385_vm0, %v399_v59, 0.0 }
  0xbc   : > { %v810_v55 = vadd.f32 %v382_v54, %v364_v53 }
  0xbe   : > { %v395_v57 = vsel %vm385_vm0, %v810_v55, 0.0  ;;  %v401_v63 = vmul.f32 %v810_v55, %v810_v55 }
  0xbf   : > { %396 = vadd.xlane.f32.xlu1 %v395_v57 }
  0xc0   : > { %v411_v0 = vsel %vm385_vm0, %v401_v63, 0.0 }
  0xc1   : > { %403 = vadd.xlane.f32.xlu2 %v402_v58 }
  0xc9   : > { %406 = vadd.xlane.f32.xlu2 %v405_v60 }
  0xd1   : > { %409 = vadd.xlane.f32.xlu2 %v408_v62 }
  0xd9   : > { %412 = vadd.xlane.f32.xlu2 %v411_v0 }
 0x124   : > { %v388_v1 = vpop.xlane.xlu2 %387 }
 0x125   : > { %v414_v3 = vmul.f32 0.0625, %v388_v1 }
 0x127   : > { %v422_v5 = vmul.f32 %v414_v3, %v414_v3  ;;  %v430_v31 = vsub.f32 %v798_v38, %v414_v3 }
 0x12a   : > { %v394_v13 = vpop.xlane.xlu0 %393 }
 0x12b   : > { %v826_v16 = vmul.f32 0.0625, %v394_v13 }
 0x12c   : > { %v391_v2 = vpop.xlane.xlu2 %390 }
 0x12d   : > { %v415_v8 = vmul.f32 0.0625, %v391_v2  ;;  %v424_v19 = vmul.f32 %v826_v16, %v826_v16 }
 0x12f   : > { %v423_v11 = vmul.f32 %v415_v8, %v415_v8  ;;  %v431_v50 = vsub.f32 %v804_v48, %v415_v8  ;;  %v432_v48 = vsub.f32 %v802_v46, %v826_v16 }
 0x132   : > { %v397_v25 = vpop.xlane.xlu1 %396 }
 0x133   : > { %v417_v32 = vmul.f32 0.0625, %v397_v25 }
 0x134   : > { %v404_v4 = vpop.xlane.xlu2 %403 }
 0x135   : > { %v418_v6 = vmul.f32 0.0625, %v404_v4  ;;  %v425_v36 = vmul.f32 %v417_v32, %v417_v32 }
 0x137   : > { %v426_v7 = vsub.f32 %v418_v6, %v422_v5  ;;  %v433_v6 = vsub.f32 %v810_v55, %v417_v32 }
 0x139   : > { %v434_v9 = vadd.f32 1e-05, %v426_v7 }
 0x13b   : > { %693 = vrsqrt.f32 %v434_v9  ;;  %vm444_vm2 = vweird.f32 %v434_v9 }
 0x13c   : > { %v407_v10 = vpop.xlane.xlu2 %406 }
 0x13d   : > { %v419_v12 = vmul.f32 0.0625, %v407_v10 }
 0x13f   : > { %v427_v14 = vsub.f32 %v419_v12, %v423_v11 }
 0x141   : > { %v694_v15 = vpop.eup %693  ;;  %v435_v17 = vadd.f32 1e-05, %v427_v14 }
 0x142   : > { %v439_v18 = vmul.f32 %v694_v15, %v434_v9  ;;  %vm445_vm1 = vweird.f32 %v694_v15 }
 0x143   : > { %695 = vrsqrt.f32 %v435_v17  ;;  %vm446_vm3 = vmor %vm444_vm2, %vm445_vm1  ;;  %vm454_vm6 = vweird.f32 %v435_v17 }
 0x144   : > { %v440_v20 = vmul.f32 %v694_v15, %v439_v18  ;;  %v410_v21 = vpop.xlane.xlu2 %409 }
 0x145   : > { %v420_v22 = vmul.f32 0.0625, %v410_v21 }
 0x146   : > { %v441_v23 = vmul.f32 0.5, %v440_v20 }
 0x147   : > { %v428_v24 = vsub.f32 %v420_v22, %v424_v19 }
 0x148   : > { %v442_v26 = vsub.f32 1.5, %v441_v23 }
 0x149   : > { %v696_v27 = vpop.eup %695  ;;  %v436_v28 = vadd.f32 1e-05, %v428_v24 }
 0x14a   : > { %v443_v29 = vmul.f32 %v694_v15, %v442_v26  ;;  %v449_v30 = vmul.f32 %v696_v27, %v435_v17  ;;  %vm455_vm5 = vweird.f32 %v696_v27 }
 0x14b   : > { %697 = vrsqrt.f32 %v436_v28  ;;  %vm456_vm7 = vmor %vm454_vm6, %vm455_vm5  ;;  %vm464_vm10 = vweird.f32 %v436_v28 }
 0x14c   : > { %v447_v33 = vsel %vm446_vm3, %v694_v15, %v443_v29  ;;  %v450_v34 = vmul.f32 %v696_v27, %v449_v30  ;;  %v413_v35 = vpop.xlane.xlu2 %412 }
 0x14d   : > { %v478_v37 = vmul.f32 %v447_v33, %v430_v31  ;;  %v421_v39 = vmul.f32 0.0625, %v413_v35 }
 0x14e   : > { %v451_v40 = vmul.f32 0.5, %v450_v34 }
 0x14f   : > { %vm482_vm4 = vcmp.ge.f32.partialorder %v478_v37, 0.0  ;;  %v486_v41 = vmul.f32 0.2, %v478_v37  ;;  %v429_v38 = vsub.f32 %v421_v39, %v425_v36 }
 0x150   : > { %v452_v42 = vsub.f32 1.5, %v451_v40 }
 0x151   : > { %v698_v43 = vpop.eup %697  ;;  %v490_v44 = vsel %vm482_vm4, %v478_v37, %v486_v41  ;;  %v437_v45 = vadd.f32 1e-05, %v429_v38 }
 0x152   : > { %494 = vst.msk [vmem:[%s835_s20] sm:$0xff] %vm385_vm0, %v490_v44  ;;  %v453_v47 = vmul.f32 %v696_v27, %v452_v42  ;;  %v459_v49 = vmul.f32 %v698_v43, %v436_v28  ;;  %vm465_vm9 = vweird.f32 %v698_v43 }
 0x153   : > { %699 = vrsqrt.f32 %v437_v45  ;;  %vm466_vm11 = vmor %vm464_vm10, %vm465_vm9  ;;  %vm474_vm14 = vweird.f32 %v437_v45 }
 0x154   : > { %v457_v51 = vsel %vm456_vm7, %v696_v27, %v453_v47  ;;  %v460_v52 = vmul.f32 %v698_v43, %v459_v49 }
 0x155   : > { %v479_v53 = vmul.f32 %v457_v51, %v431_v50 }
 0x156   : > { %v461_v54 = vmul.f32 0.5, %v460_v52 }
 0x157   : > { %vm483_vm8 = vcmp.ge.f32.partialorder %v479_v53, 0.0  ;;  %v487_v56 = vmul.f32 0.2, %v479_v53 }
 0x158   : > { %v462_v57 = vsub.f32 1.5, %v461_v54 }
 0x159   : > { %v700_v58 = vpop.eup %699  ;;  %v491_v59 = vsel %vm483_vm8, %v479_v53, %v487_v56 }
 0x15a   : > { %495 = vst.msk [vmem:[%s835_s20 + $0x8] sm:$0xff] %vm385_vm0, %v491_v59  ;;  %v463_v60 = vmul.f32 %v698_v43, %v462_v57  ;;  %v469_v61 = vmul.f32 %v700_v58, %v437_v45  ;;  %vm475_vm13 = vweird.f32 %v700_v58 }
 0x15b   : > { %vm476_vm15 = vmor %vm474_vm14, %vm475_vm13 }
 0x15c   : > { %v467_v62 = vsel %vm466_vm11, %v698_v43, %v463_v60  ;;  %v470_v63 = vmul.f32 %v700_v58, %v469_v61 }
 0x15d   : > { %v480_v0 = vmul.f32 %v467_v62, %v432_v48 }
 0x15e   : > { %v471_v1 = vmul.f32 0.5, %v470_v63 }
 0x15f   : > { %vm484_vm12 = vcmp.ge.f32.partialorder %v480_v0, 0.0  ;;  %v488_v2 = vmul.f32 0.2, %v480_v0 }
 0x160   : > { %v472_v3 = vsub.f32 1.5, %v471_v1 }
 0x161   : > { %v492_v4 = vsel %vm484_vm12, %v480_v0, %v488_v2 }
 0x162   : > { %496 = vst.msk [vmem:[%s835_s20 + $0x10] sm:$0xff] %vm385_vm0, %v492_v4  ;;  %v473_v5 = vmul.f32 %v700_v58, %v472_v3 }
 0x164   : > { %v477_v7 = vsel %vm476_vm15, %v700_v58, %v473_v5 }
 0x165   : > { %v481_v46 = vmul.f32 %v477_v7, %v433_v6 }
 0x167   : > { %vm485_vm1 = vcmp.ge.f32.partialorder %v481_v46, 0.0  ;;  %v489_v8 = vmul.f32 0.2, %v481_v46 }
 0x169   : > { %v493_v9 = vsel %vm485_vm1, %v481_v46, %v489_v8 }
 0x16a   : > { %497 = vst.msk [vmem:[%s835_s20 + $0x18] sm:$0xff] %vm385_vm0, %v493_v9 }
 0x16b PF: > { %s13_s12 = sadd.s32 1, %s707_s12  }
 0x16c   : > { %p10_p4 = scmp.ge.s32.totalorder %s13_s12, 4  }
 0x16e   :  { %12 = sbr.rel (!%p10_p4) target bundleno = 1 (0x1), region = 62 }

// kernel: patch_discriminator_forward.8
= control target key start
LH: loop header
LB: loop body
LE: loop exit
PB: predicated region body
PF: predicated region fallthrough
CT: control target
= control target key end

     0   :  { %s1277_s12 = smov 0   ;;  %s1554_s0 = inlined_call_operand.vmem [shape: bf16[2,512,9], index: 0, kind: input, shape index: {}]   ;;  %s1555_s1 = inlined_call_operand.vmem [shape: bf16[64,512], index: 1, kind: input, shape index: {}]   ;;  %s1556_s2 = inlined_call_operand.vmem [shape: f32[64,1], index: 2, kind: input, shape index: {}]   ;;  %s1557_s3 = inlined_call_operand.vmem [shape: f32[2,64,9], index: 3, kind: output, shape index: {}]  }
   0x1 LB: > { %s967_s13 = sadd.s32 4294967295, %s1254_s12   ;;  %p971_p0 = scmp.ge.s32.totalorder %s1254_s12, 1  ;;  %s1254_s12 = sphi %s1277_s12, %s13_s12  }
   0x2   : > { %p137_p1 = scmp.lt.s32.totalorder %s1254_s12, 3 }
   0x4   : > { %p138_p2 = pnand %p971_p0, %p137_p1 }
   0x5   : > { %p161_p3 = scmp.lt.s32.totalorder (!%p138_p2), %s967_s13, 1 }
   0x6   : > { %141 = sbr.rel (%p138_p2) target bundleno = 395 (0x18b), region = 32 }
   0xb   : > { %s1559_s13 = smov (!%p161_p3, %s967_s13), 1  ;;  %v1256_v8 = vmov 0   ;;  %v251_v17 = vld [vmem:[%s1556_s2] sm:$0xff]  ;;  %v252_v24 = vld [vmem:[%s1556_s2 + $0x8] sm:$0xff]  ;;  %v253_v25 = vld [vmem:[%s1556_s2 + $0x10] sm:$0xff]  ;;  %vm687_vm0 = vcmask 72704  }
   0xc   : > { %s1170_s14 = sshll.u32 %s1559_s13, 8  ;;  %1229 = vset.pattern.permute.xlu0 %v1256_v8  ;;  %1230 = vset.pattern.permute.xlu1 %v1256_v8  ;;  %v978_v32 = vld [vmem:[%s1555_s1] sm:$0xf]  ;;  %v1206_v33 = vld [vmem:[%s1555_s1 + $0xc] sm:$0xf0]  ;;  %v254_v48 = vld [vmem:[%s1556_s2 + $0x18] sm:$0xff] }
   0xd   : > { %s1291_s17 = scalar_lea.vmem %s1554_s0, %s1170_s14  ;;  %1231 = vset.pattern.permute.xlu2 %v1256_v8  ;;  %261 = vperm.xlu0 %1229, %v251_v17   ;;  %v1204_v34 = vld [vmem:[%s1555_s1 + $0x4] sm:$0xf]  ;;  %v980_v39 = vld [vmem:[%s1555_s1 + $0x10] sm:$0xf0]  ;;  %v986_v40 = vld [vmem:[%s1555_s1 + $0x8] sm:$0xf]  ;;  %v979_v44 = vor.u32 %v1206_v33, %v978_v32 }
   0xe   : > { %v1179_v0 = vld [vmem:[%s1291_s17 + $0x38] sm:$0xff]  ;;  %v1178_v4 = vld [vmem:[%s1291_s17 + $0x30] sm:$0xff]  ;;  %v1177_v9 = vld [vmem:[%s1291_s17 + $0x28] sm:$0xff]  ;;  %271 = vperm.xlu1 %1230, %v253_v25   ;;  %v983_v45 = vor.u32 %v1204_v34, %v980_v39  ;;  %s1171_s23 = sshll.u32 %s1559_s13, 6 }
   0xf   : > { %v1187_v1 = vld [vmem:[%s1291_s17 + $0x78] sm:$0xff]  ;;  %571 = vmatpush.bf16.msra.mxu0 %v1179_v0  ;;  %v1186_v5 = vld [vmem:[%s1291_s17 + $0x70] sm:$0xff]  ;;  %v1185_v10 = vld [vmem:[%s1291_s17 + $0x68] sm:$0xff]  ;;  %s1512_s26 = scalar_lea.vmem %s1557_s3, %s1171_s23 }
  0x10   : > { %v1195_v2 = vld [vmem:[%s1291_s17 + $0xb8] sm:$0xff]  ;;  %600 = vmatpush.bf16.msra.mxu1 %v1187_v1  ;;  %v1194_v6 = vld [vmem:[%s1291_s17 + $0xb0] sm:$0xff]  ;;  %v1193_v11 = vld [vmem:[%s1291_s17 + $0xa8] sm:$0xff] }
  0x11   : > { %v1203_v3 = vld [vmem:[%s1291_s17 + $0xf8] sm:$0xff]  ;;  %629 = vmatpush.bf16.msra.mxu2 %v1195_v2  ;;  %v1202_v7 = vld [vmem:[%s1291_s17 + $0xf0] sm:$0xff]  ;;  %v1201_v12 = vld [vmem:[%s1291_s17 + $0xe8] sm:$0xff] }
  0x12   : > { %658 = vmatpush.bf16.msra.mxu3 %v1203_v3  ;;  %v1176_v13 = vld [vmem:[%s1291_s17 + $0x20] sm:$0xff]  ;;  %v1175_v18 = vld [vmem:[%s1291_s17 + $0x18] sm:$0xff]  ;;  %v1174_v22 = vld [vmem:[%s1291_s17 + $0x10] sm:$0xff] }
  0x13   : > { %572 = vmatpush.bf16.msra.mxu0 %v1178_v4  ;;  %v1184_v14 = vld [vmem:[%s1291_s17 + $0x60] sm:$0xff]  ;;  %v1183_v19 = vld [vmem:[%s1291_s17 + $0x58] sm:$0xff]  ;;  %v1182_v23 = vld [vmem:[%s1291_s17 + $0x50] sm:$0xff] }
  0x14   : > { %601 = vmatpush.bf16.msra.mxu1 %v1186_v5  ;;  %v1192_v15 = vld [vmem:[%s1291_s17 + $0xa0] sm:$0xff]  ;;  %v1191_v20 = vld [vmem:[%s1291_s17 + $0x98] sm:$0xff]  ;;  %v1190_v26 = vld [vmem:[%s1291_s17 + $0x90] sm:$0xff] }
  0x15   : > { %630 = vmatpush.bf16.msra.mxu2 %v1194_v6  ;;  %v1200_v16 = vld [vmem:[%s1291_s17 + $0xe0] sm:$0xff]  ;;  %v1199_v21 = vld [vmem:[%s1291_s17 + $0xd8] sm:$0xff]  ;;  %v1198_v27 = vld [vmem:[%s1291_s17 + $0xd0] sm:$0xff]  ;;  %266 = vperm.xlu0 %1229, %v252_v24  }
  0x16   : > { %659 = vmatpush.bf16.msra.mxu3 %v1202_v7  ;;  %v1173_v28 = vld [vmem:[%s1291_s17 + $0x8] sm:$0xff]  ;;  %v1172_v35 = vld [vmem:[%s1291_s17] sm:$0xff]  ;;  %v1207_v41 = vld [vmem:[%s1555_s1 + $0x14] sm:$0xf0]  ;;  %276 = vperm.xlu1 %1230, %v254_v48  }
  0x17   : > { %573 = vmatpush.bf16.msra.mxu0 %v1177_v9  ;;  %v1181_v29 = vld [vmem:[%s1291_s17 + $0x48] sm:$0xff]  ;;  %v1180_v36 = vld [vmem:[%s1291_s17 + $0x40] sm:$0xff]  ;;  %v988_v43 = vld [vmem:[%s1555_s1 + $0x18] sm:$0xf0]  ;;  %v987_v46 = vor.u32 %v1207_v41, %v986_v40 }
  0x18   : > { %602 = vmatpush.bf16.msra.mxu1 %v1185_v10  ;;  %v1189_v30 = vld [vmem:[%s1291_s17 + $0x88] sm:$0xff]  ;;  %v1188_v37 = vld [vmem:[%s1291_s17 + $0x80] sm:$0xff]  ;;  %v257_v49 = vld [vmem:[%s1556_s2 + $0x30] sm:$0xff] }
  0x19   : > { %631 = vmatpush.bf16.msra.mxu2 %v1193_v11  ;;  %v1197_v31 = vld [vmem:[%s1291_s17 + $0xc8] sm:$0xff]  ;;  %v1196_v38 = vld [vmem:[%s1291_s17 + $0xc0] sm:$0xff]  ;;  %v258_v50 = vld [vmem:[%s1556_s2 + $0x38] sm:$0xff] }
  0x1a   : > { %660 = vmatpush.bf16.msra.mxu3 %v1201_v12  ;;  %v1205_v42 = vld [vmem:[%s1555_s1 + $0xc] sm:$0xf]  ;;  %v994_v51 = vld [vmem:[%s1555_s1 + $0x20] sm:$0xf]  ;;  %v1210_v52 = vld [vmem:[%s1555_s1 + $0x2c] sm:$0xf0] }
  0x1b   : > { %574 = vmatpush.bf16.msra.mxu0 %v1176_v13  ;;  %v991_v47 = vor.u32 %v1205_v42, %v988_v43  ;;  %v1208_v53 = vld [vmem:[%s1555_s1 + $0x24] sm:$0xf]  ;;  %v996_v54 = vld [vmem:[%s1555_s1 + $0x30] sm:$0xf0]  ;;  %v1002_v55 = vld [vmem:[%s1555_s1 + $0x28] sm:$0xf]  ;;  %v995_v59 = vor.u32 %v1210_v52, %v994_v51 }
  0x1c   : > { %603 = vmatpush.bf16.msra.mxu1 %v1184_v14  ;;  %v1211_v56 = vld [vmem:[%s1555_s1 + $0x34] sm:$0xf0]  ;;  %v1209_v57 = vld [vmem:[%s1555_s1 + $0x2c] sm:$0xf]  ;;  %v1004_v58 = vld [vmem:[%s1555_s1 + $0x38] sm:$0xf0]  ;;  %v999_v60 = vor.u32 %v1208_v53, %v996_v54 }
  0x1d   : > { %632 = vmatpush.bf16.msra.mxu2 %v1192_v15  ;;  %291 = vperm.xlu0 %1229, %v257_v49   ;;  %v1003_v61 = vor.u32 %v1211_v56, %v1002_v55  ;;  %v1007_v62 = vor.u32 %v1209_v57, %v1004_v58  ;;  %v255_v63 = vld [vmem:[%s1556_s2 + $0x20] sm:$0xff]  ;;  %v256_v0 = vld [vmem:[%s1556_s2 + $0x28] sm:$0xff]  ;;  %v1214_v2 = vld [vmem:[%s1555_s1 + $0x4c] sm:$0xf0] }
  0x1e   : > { %661 = vmatpush.bf16.msra.mxu3 %v1200_v16  ;;  %296 = vperm.xlu1 %1230, %v258_v50   ;;  %v1010_v1 = vld [vmem:[%s1555_s1 + $0x40] sm:$0xf]  ;;  %v1212_v3 = vld [vmem:[%s1555_s1 + $0x44] sm:$0xf]  ;;  %v1012_v4 = vld [vmem:[%s1555_s1 + $0x50] sm:$0xf0] }
  0x1f   : > { %575 = vmatpush.bf16.msra.mxu0 %v1175_v18  ;;  %281 = vperm.xlu2 %1231, %v255_v63   ;;  %v1018_v5 = vld [vmem:[%s1555_s1 + $0x48] sm:$0xf]  ;;  %v1215_v6 = vld [vmem:[%s1555_s1 + $0x54] sm:$0xf0]  ;;  %v1213_v7 = vld [vmem:[%s1555_s1 + $0x4c] sm:$0xf]  ;;  %v1011_v9 = vor.u32 %v1214_v2, %v1010_v1  ;;  %v1015_v10 = vor.u32 %v1212_v3, %v1012_v4 }
  0x20   : > { %604 = vmatpush.bf16.msra.mxu1 %v1183_v19  ;;  %v1020_v8 = vld [vmem:[%s1555_s1 + $0x58] sm:$0xf0]  ;;  %v1019_v11 = vor.u32 %v1215_v6, %v1018_v5  ;;  %v1026_v13 = vld [vmem:[%s1555_s1 + $0x60] sm:$0xf]  ;;  %v1218_v14 = vld [vmem:[%s1555_s1 + $0x6c] sm:$0xf0] }
  0x21   : > { %633 = vmatpush.bf16.msra.mxu2 %v1191_v20  ;;  %v1023_v12 = vor.u32 %v1213_v7, %v1020_v8  ;;  %v1216_v15 = vld [vmem:[%s1555_s1 + $0x64] sm:$0xf]  ;;  %v1028_v16 = vld [vmem:[%s1555_s1 + $0x70] sm:$0xf0]  ;;  %v1034_v17 = vld [vmem:[%s1555_s1 + $0x68] sm:$0xf] }
  0x22   : > { %662 = vmatpush.bf16.msra.mxu3 %v1199_v21  ;;  %v1219_v18 = vld [vmem:[%s1555_s1 + $0x74] sm:$0xf0]  ;;  %v1217_v19 = vld [vmem:[%s1555_s1 + $0x6c] sm:$0xf]  ;;  %v1036_v20 = vld [vmem:[%s1555_s1 + $0x78] sm:$0xf0]  ;;  %v1027_v21 = vor.u32 %v1218_v14, %v1026_v13 }
  0x23   : > { %576 = vmatpush.bf16.msra.mxu0 %v1174_v22  ;;  %v1031_v22 = vor.u32 %v1216_v15, %v1028_v16  ;;  %v1039_v24 = vor.u32 %v1217_v19, %v1036_v20 }
  0x24   : > { %605 = vmatpush.bf16.msra.mxu1 %v1182_v23  ;;  %v1035_v23 = vor.u32 %v1219_v18, %v1034_v17 }
  0x25   : > { %634 = vmatpush.bf16.msra.mxu2 %v1190_v26 }
  0x26   : > { %663 = vmatpush.bf16.msra.mxu3 %v1198_v27 }
  0x27   : > { %577 = vmatpush.bf16.msra.mxu0 %v1173_v28  ;;  %286 = vperm.xlu2 %1231, %v256_v0  }
  0x28   : > { %606 = vmatpush.bf16.msra.mxu1 %v1181_v29 }
  0x29   : > { %635 = vmatpush.bf16.msra.mxu2 %v1189_v30 }
  0x2a   : > { %664 = vmatpush.bf16.msra.mxu3 %v1197_v31 }
  0x2b   : > { %578 = vmatpush.bf16.msra.mxu0 %v1172_v35 }
  0x2c   : > { %607 = vmatpush.bf16.msra.mxu1 %v1180_v36 }
  0x2d   : > { %636 = vmatpush.bf16.msra.mxu2 %v1188_v37 }
  0x2e   : > { %665 = vmatpush.bf16.msra.mxu3 %v1196_v38  ;;  %579 = vmatmul.bf16.vlgmr.msra.gmra.mxu0 %v979_v44 }
  0x2f   : > { %608 = vmatmul.bf16.vlgmr.msra.gmra.mxu1 %v983_v45 }
  0x30   : > { %637 = vmatmul.bf16.vlgmr.msra.gmra.mxu2 %v987_v46 }
  0x31   : > { %666 = vmatmul.bf16.vlgmr.msra.gmra.mxu3 %v991_v47 }
  0x3e   : > { %584 = vmatmul.bf16.gmra.mxu0 %v995_v59 }
  0x3f   : > { %613 = vmatmul.bf16.gmra.mxu1 %v999_v60 }
  0x40   : > { %642 = vmatmul.bf16.gmra.mxu2 %v1003_v61 }
  0x41   : > { %671 = vmatmul.bf16.gmra.mxu3 %v1007_v62 }
  0x4e   : > { %589 = vmatmul.bf16.gmra.mxu0 %v1011_v9 }
  0x4f   : > { %618 = vmatmul.bf16.gmra.mxu1 %v1015_v10 }
  0x50   : > { %647 = vmatmul.bf16.gmra.mxu2 %v1019_v11 }
  0x51   : > { %676 = vmatmul.bf16.gmra.mxu3 %v1023_v12 }
  0x5e   : > { %594 = vmatmul.bf16.gmra.mxu0 %v1027_v21 }
  0x5f   : > { %623 = vmatmul.bf16.gmra.mxu1 %v1031_v22 }
  0x60   : > { %652 = vmatmul.bf16.gmra.mxu2 %v1035_v23 }
  0x61   : > { %681 = vmatmul.bf16.gmra.mxu3 %v1039_v24 }
  0x79   : > { %v282_v63 = vpop.permute.xlu2 %281 }
  0x7f   : > { %v262_v25 = vpop.permute.xlu0 %261 }
  0x80   : > { %v272_v40 = vpop.permute.xlu1 %271 }
  0x81   : > { %v287_v14 = vpop.permute.xlu2 %286 }
  0x87   : > { %v267_v30 = vpop.permute.xlu0 %266 }
  0x88   : > { %v277_v54 = vpop.permute.xlu1 %276 }
  0xab   : > { %v580_v26 = vpop.f32.mrf.mxu0 }
  0xac   : > { %v609_v27 = vpop.f32.mrf.mxu1  ;;  %v581_v28 = vadd.f32 %v580_v26, %v262_v25 }
  0xae   : > { %v610_v29 = vadd.f32 %v609_v27, %v581_v28 }
  0xb3   : > { %v638_v31 = vpop.f32.mrf.mxu2  ;;  %v582_v34 = vpop.f32.mrf.mxu0 }
  0xb4   : > { %v667_v32 = vpop.f32.mrf.mxu3  ;;  %v639_v33 = vadd.f32 %v638_v31, %v610_v29  ;;  %v611_v35 = vpop.f32.mrf.mxu1  ;;  %v583_v37 = vadd.f32 %v582_v34, %v267_v30 }
  0xb5   : > { %v292_v30 = vpop.permute.xlu0 %291 }
  0xb6   : > { %v1445_v36 = vadd.f32 %v667_v32, %v639_v33  ;;  %v612_v41 = vadd.f32 %v611_v35, %v583_v37 }
  0xb8   : > { %v688_v38 = vsel %vm687_vm0, %v1445_v36, 0.0  ;;  %v712_v39 = vmul.f32 %v1445_v36, %v1445_v36 }
  0xb9   : > { %689 = vadd.xlane.f32.xlu2 %v688_v38 }
  0xba   : > { %v720_v42 = vsel %vm687_vm0, %v712_v39, 0.0 }
  0xbb   : > { %v640_v43 = vpop.f32.mrf.mxu2  ;;  %721 = vadd.xlane.f32.xlu0 %v720_v42  ;;  %v585_v46 = vpop.f32.mrf.mxu0 }
  0xbc   : > { %v669_v44 = vpop.f32.mrf.mxu3  ;;  %v641_v45 = vadd.f32 %v640_v43, %v612_v41  ;;  %v614_v47 = vpop.f32.mrf.mxu1  ;;  %v586_v48 = vadd.f32 %v585_v46, %v272_v40 }
  0xbd   : > { %v297_v41 = vpop.permute.xlu1 %296 }
  0xbe   : > { %v1452_v49 = vadd.f32 %v669_v44, %v641_v45  ;;  %v615_v50 = vadd.f32 %v614_v47, %v586_v48 }
  0xc0   : > { %v713_v51 = vmul.f32 %v1452_v49, %v1452_v49  ;;  %v691_v53 = vsel %vm687_vm0, %v1452_v49, 0.0 }
  0xc2   : > { %v723_v52 = vsel %vm687_vm0, %v713_v51, 0.0 }
  0xc3   : > { %v643_v55 = vpop.f32.mrf.mxu2  ;;  %724 = vadd.xlane.f32.xlu1 %v723_v52  ;;  %692 = vadd.xlane.f32.xlu0 %v691_v53  ;;  %v587_v58 = vpop.f32.mrf.mxu0 }
  0xc4   : > { %v672_v56 = vpop.f32.mrf.mxu3  ;;  %v644_v57 = vadd.f32 %v643_v55, %v615_v50  ;;  %v616_v59 = vpop.f32.mrf.mxu1  ;;  %v588_v61 = vadd.f32 %v587_v58, %v277_v54 }
  0xc6   : > { %v1459_v60 = vadd.f32 %v672_v56, %v644_v57  ;;  %v617_v0 = vadd.f32 %v616_v59, %v588_v61 }
  0xc8   : > { %v714_v62 = vmul.f32 %v1459_v60, %v1459_v60  ;;  %v694_v1 = vsel %vm687_vm0, %v1459_v60, 0.0 }
  0xca   : > { %v726_v2 = vsel %vm687_vm0, %v714_v62, 0.0 }
  0xcb   : > { %v645_v3 = vpop.f32.mrf.mxu2  ;;  %695 = vadd.xlane.f32.xlu1 %v694_v1  ;;  %727 = vadd.xlane.f32.xlu2 %v726_v2  ;;  %v590_v6 = vpop.f32.mrf.mxu0 }
  0xcc   : > { %v674_v4 = vpop.f32.mrf.mxu3  ;;  %v646_v5 = vadd.f32 %v645_v3, %v617_v0  ;;  %v619_v7 = vpop.f32.mrf.mxu1  ;;  %v591_v8 = vadd.f32 %v590_v6, %v282_v63 }
  0xce   : > { %v1466_v9 = vadd.f32 %v674_v4, %v646_v5  ;;  %v620_v10 = vadd.f32 %v619_v7, %v591_v8 }
  0xd0   : > { %v715_v11 = vmul.f32 %v1466_v9, %v1466_v9  ;;  %v697_v13 = vsel %vm687_vm0, %v1466_v9, 0.0 }
  0xd2   : > { %v729_v12 = vsel %vm687_vm0, %v715_v11, 0.0 }
  0xd3   : > { %v648_v15 = vpop.f32.mrf.mxu2  ;;  %730 = vadd.xlane.f32.xlu0 %v729_v12  ;;  %698 = vadd.xlane.f32.xlu2 %v697_v13  ;;  %v592_v18 = vpop.f32.mrf.mxu0 }
  0xd4   : > { %v677_v16 = vpop.f32.mrf.mxu3  ;;  %v649_v17 = vadd.f32 %v648_v15, %v620_v10  ;;  %v621_v19 = vpop.f32.mrf.mxu1  ;;  %v593_v21 = vadd.f32 %v592_v18, %v287_v14 }
  0xd6   : > { %v1473_v20 = vadd.f32 %v677_v16, %v649_v17  ;;  %v622_v23 = vadd.f32 %v621_v19, %v593_v21 }
  0xd8   : > { %v716_v22 = vmul.f32 %v1473_v20, %v1473_v20  ;;  %v700_v25 = vsel %vm687_vm0, %v1473_v20, 0.0 }
  0xda   : > { %v732_v24 = vsel %vm687_vm0, %v716_v22, 0.0 }
  0xdb   : > { %v650_v26 = vpop.f32.mrf.mxu2  ;;  %733 = vadd.xlane.f32.xlu1 %v732_v24  ;;  %701 = vadd.xlane.f32.xlu2 %v700_v25  ;;  %v595_v29 = vpop.f32.mrf.mxu0 }
  0xdc   : > { %v679_v27 = vpop.f32.mrf.mxu3  ;;  %v651_v28 = vadd.f32 %v650_v26, %v622_v23  ;;  %v596_v32 = vadd.f32 %v595_v29, %v292_v30  ;;  %v624_v33 = vpop.f32.mrf.mxu1 }
  0xde   : > { %v1480_v31 = vadd.f32 %v679_v27, %v651_v28  ;;  %v625_v35 = vadd.f32 %v624_v33, %v596_v32 }
  0xe0   : > { %v703_v34 = vsel %vm687_vm0, %v1480_v31, 0.0  ;;  %v717_v57 = vmul.f32 %v1480_v31, %v1480_v31 }
  0xe1   : > { %704 = vadd.xlane.f32.xlu0 %v703_v34 }
  0xe2   : > { %v735_v58 = vsel %vm687_vm0, %v717_v57, 0.0 }
  0xe3   : > { %v653_v37 = vpop.f32.mrf.mxu2  ;;  %v597_v40 = vpop.f32.mrf.mxu0 }
  0xe4   : > { %v682_v38 = vpop.f32.mrf.mxu3  ;;  %v654_v39 = vadd.f32 %v653_v37, %v625_v35  ;;  %v598_v43 = vadd.f32 %v597_v40, %v297_v41  ;;  %v626_v46 = vpop.f32.mrf.mxu1 }
  0xe6   : > { %v1484_v42 = vadd.f32 %v682_v38, %v654_v39  ;;  %v627_v47 = vadd.f32 %v626_v46, %v598_v43 }
  0xe8   : > { %v706_v44 = vsel %vm687_vm0, %v1484_v42, 0.0  ;;  %v718_v45 = vmul.f32 %v1484_v42, %v1484_v42 }
  0xe9   : > { %707 = vadd.xlane.f32.xlu1 %v706_v44 }
  0xea   : > { %v738_v48 = vsel %vm687_vm0, %v718_v45, 0.0 }
  0xeb   : > { %v655_v50 = vpop.f32.mrf.mxu2  ;;  %739 = vadd.xlane.f32.xlu0 %v738_v48 }
  0xec   : > { %v656_v51 = vadd.f32 %v655_v50, %v627_v47  ;;  %v684_v52 = vpop.f32.mrf.mxu3 }
  0xee   : > { %v1491_v53 = vadd.f32 %v684_v52, %v656_v51 }
  0xf0   : > { %v709_v54 = vsel %vm687_vm0, %v1491_v53, 0.0  ;;  %v719_v55 = vmul.f32 %v1491_v53, %v1491_v53 }
  0xf1   : > { %710 = vadd.xlane.f32.xlu2 %v709_v54 }
  0xf2   : > { %v741_v56 = vsel %vm687_vm0, %v719_v55, 0.0 }
  0xf3   : > { %742 = vadd.xlane.f32.xlu1 %v741_v56 }
  0xf9   : > { %736 = vadd.xlane.f32.xlu2 %v735_v58 }
 0x12c   : > { %v690_v59 = vpop.xlane.xlu2 %689 }
 0x12d   : > { %v744_v61 = vmul.f32 0.11111111, %v690_v59 }
 0x12e   : > { %v722_v62 = vpop.xlane.xlu0 %721 }
 0x12f   : > { %v760_v63 = vmul.f32 %v744_v61, %v744_v61  ;;  %v752_v0 = vmul.f32 0.11111111, %v722_v62  ;;  %v776_v25 = vsub.f32 %v1445_v36, %v744_v61 }
 0x131   : > { %v768_v1 = vsub.f32 %v752_v0, %v760_v63 }
 0x133   : > { %v784_v2 = vadd.f32 1e-05, %v768_v1 }
 0x135   : > { %1232 = vrsqrt.f32 %v784_v2  ;;  %vm798_vm2 = vweird.f32 %v784_v2 }
 0x136   : > { %v725_v3 = vpop.xlane.xlu1 %724  ;;  %v693_v4 = vpop.xlane.xlu0 %692 }
 0x137   : > { %v745_v5 = vmul.f32 0.11111111, %v693_v4  ;;  %v753_v6 = vmul.f32 0.11111111, %v725_v3 }
 0x139   : > { %v761_v7 = vmul.f32 %v745_v5, %v745_v5  ;;  %v777_v50 = vsub.f32 %v1452_v49, %v745_v5 }
 0x13b   : > { %v1233_v8 = vpop.eup %1232  ;;  %v769_v10 = vsub.f32 %v753_v6, %v761_v7 }
 0x13c   : > { %v793_v11 = vmul.f32 %v1233_v8, %v784_v2  ;;  %vm799_vm1 = vweird.f32 %v1233_v8 }
 0x13d   : > { %v785_v12 = vadd.f32 1e-05, %v769_v10  ;;  %vm800_vm3 = vmor %vm798_vm2, %vm799_vm1 }
 0x13e   : > { %v794_v13 = vmul.f32 %v1233_v8, %v793_v11  ;;  %v696_v14 = vpop.xlane.xlu1 %695  ;;  %v728_v15 = vpop.xlane.xlu2 %727 }
 0x13f   : > { %1234 = vrsqrt.f32 %v785_v12  ;;  %v1501_v16 = vmul.f32 0.11111111, %v696_v14  ;;  %v754_v19 = vmul.f32 0.11111111, %v728_v15  ;;  %vm808_vm6 = vweird.f32 %v785_v12 }
 0x140   : > { %v795_v17 = vmul.f32 0.5, %v794_v13 }
 0x141   : > { %v762_v18 = vmul.f32 %v1501_v16, %v1501_v16  ;;  %v778_v3 = vsub.f32 %v1459_v60, %v1501_v16 }
 0x142   : > { %v796_v21 = vsub.f32 1.5, %v795_v17 }
 0x143   : > { %v770_v22 = vsub.f32 %v754_v19, %v762_v18 }
 0x144   : > { %v797_v23 = vmul.f32 %v1233_v8, %v796_v21 }
 0x145   : > { %v1235_v24 = vpop.eup %1234  ;;  %v786_v26 = vadd.f32 1e-05, %v770_v22 }
 0x146   : > { %v801_v27 = vsel %vm800_vm3, %v1233_v8, %v797_v23  ;;  %v803_v28 = vmul.f32 %v1235_v24, %v785_v12  ;;  %v699_v29 = vpop.xlane.xlu2 %698  ;;  %v731_v32 = vpop.xlane.xlu0 %730  ;;  %vm809_vm5 = vweird.f32 %v1235_v24 }
 0x147   : > { %v872_v30 = vmul.f32 %v801_v27, %v776_v25  ;;  %1236 = vrsqrt.f32 %v786_v26  ;;  %v1507_v34 = vmul.f32 0.11111111, %v699_v29  ;;  %v755_v37 = vmul.f32 0.11111111, %v731_v32  ;;  %vm810_vm7 = vmor %vm808_vm6, %vm809_vm5 }
 0x148   : > { %v804_v33 = vmul.f32 %v1235_v24, %v803_v28  ;;  %vm818_vm10 = vweird.f32 %v786_v26 }
 0x149   : > { %vm880_vm4 = vcmp.ge.f32.partialorder %v872_v30, 0.0  ;;  %v888_v36 = vmul.f32 0.2, %v872_v30  ;;  %v763_v38 = vmul.f32 %v1507_v34, %v1507_v34  ;;  %v779_v21 = vsub.f32 %v1466_v9, %v1507_v34 }
 0x14a   : > { %v805_v35 = vmul.f32 0.5, %v804_v33 }
 0x14b   : > { %v896_v39 = vsel %vm880_vm4, %v872_v30, %v888_v36  ;;  %v771_v41 = vsub.f32 %v755_v37, %v763_v38 }
 0x14c   : > { %904 = vst.msk [vmem:[%s1512_s26] sm:$0xff] %vm687_vm0, %v896_v39  ;;  %v806_v40 = vsub.f32 1.5, %v805_v35 }
 0x14d   : > { %v1237_v43 = vpop.eup %1236  ;;  %v787_v46 = vadd.f32 1e-05, %v771_v41 }
 0x14e   : > { %v807_v44 = vmul.f32 %v1235_v24, %v806_v40  ;;  %v813_v45 = vmul.f32 %v1237_v43, %v786_v26  ;;  %v734_v47 = vpop.xlane.xlu1 %733  ;;  %v702_v48 = vpop.xlane.xlu2 %701  ;;  %vm819_vm9 = vweird.f32 %v1237_v43 }
 0x14f   : > { %v1519_v51 = vmul.f32 0.11111111, %v702_v48  ;;  %1238 = vrsqrt.f32 %v787_v46  ;;  %v756_v56 = vmul.f32 0.11111111, %v734_v47  ;;  %vm820_vm11 = vmor %vm818_vm10, %vm819_vm9  ;;  %vm828_vm14 = vweird.f32 %v787_v46 }
 0x150   : > { %v811_v52 = vsel %vm810_vm7, %v1235_v24, %v807_v44  ;;  %v814_v54 = vmul.f32 %v1237_v43, %v813_v45 }
 0x151   : > { %v873_v55 = vmul.f32 %v811_v52, %v777_v50  ;;  %v764_v57 = vmul.f32 %v1519_v51, %v1519_v51  ;;  %v780_v9 = vsub.f32 %v1473_v20, %v1519_v51 }
 0x152   : > { %v815_v58 = vmul.f32 0.5, %v814_v54 }
 0x153   : > { %vm881_vm8 = vcmp.ge.f32.partialorder %v873_v55, 0.0  ;;  %v889_v59 = vmul.f32 0.2, %v873_v55  ;;  %v772_v61 = vsub.f32 %v756_v56, %v764_v57 }
 0x154   : > { %v816_v62 = vsub.f32 1.5, %v815_v58  ;;  %v705_v2 = vpop.xlane.xlu0 %704 }
 0x155   : > { %v897_v63 = vsel %vm881_vm8, %v873_v55, %v889_v59  ;;  %v788_v49 = vadd.f32 1e-05, %v772_v61  ;;  %v1239_v0 = vpop.eup %1238  ;;  %v749_v40 = vmul.f32 0.11111111, %v705_v2 }
 0x156   : > { %905 = vst.msk [vmem:[%s1512_s26 + $0x8] sm:$0xff] %vm687_vm0, %v897_v63  ;;  %v817_v1 = vmul.f32 %v1237_v43, %v816_v62  ;;  %v823_v4 = vmul.f32 %v1239_v0, %v787_v46  ;;  %vm829_vm13 = vweird.f32 %v1239_v0 }
 0x157   : > { %1240 = vrsqrt.f32 %v788_v49  ;;  %vm830_vm15 = vmor %vm828_vm14, %vm829_vm13  ;;  %vm838_vm3 = vweird.f32 %v788_v49  ;;  %v765_v50 = vmul.f32 %v749_v40, %v749_v40 }
 0x158   : > { %v821_v5 = vsel %vm820_vm11, %v1237_v43, %v817_v1  ;;  %v824_v7 = vmul.f32 %v1239_v0, %v823_v4 }
 0x159   : > { %v874_v6 = vmul.f32 %v821_v5, %v778_v3 }
 0x15a   : > { %v825_v10 = vmul.f32 0.5, %v824_v7 }
 0x15b   : > { %vm882_vm12 = vcmp.ge.f32.partialorder %v874_v6, 0.0  ;;  %v890_v8 = vmul.f32 0.2, %v874_v6 }
 0x15c   : > { %v708_v11 = vpop.xlane.xlu1 %707  ;;  %v826_v14 = vsub.f32 1.5, %v825_v10 }
 0x15d   : > { %v1241_v12 = vpop.eup %1240  ;;  %v898_v13 = vsel %vm882_vm12, %v874_v6, %v890_v8  ;;  %v1527_v15 = vmul.f32 0.11111111, %v708_v11 }
 0x15e   : > { %906 = vst.msk [vmem:[%s1512_s26 + $0x10] sm:$0xff] %vm687_vm0, %v898_v13  ;;  %v833_v60 = vmul.f32 %v1241_v12, %v788_v49  ;;  %v740_v16 = vpop.xlane.xlu0 %739  ;;  %v827_v17 = vmul.f32 %v1239_v0, %v826_v14  ;;  %vm839_vm2 = vweird.f32 %v1241_v12 }
 0x15f   : > { %v766_v18 = vmul.f32 %v1527_v15, %v1527_v15  ;;  %v758_v19 = vmul.f32 0.11111111, %v740_v16  ;;  %vm840_vm4 = vmor %vm838_vm3, %vm839_vm2  ;;  %v782_v61 = vsub.f32 %v1484_v42, %v1527_v15  ;;  %v781_v15 = vsub.f32 %v1480_v31, %v749_v40 }
 0x160   : > { %v834_v22 = vmul.f32 %v1241_v12, %v833_v60  ;;  %v831_v23 = vsel %vm830_vm15, %v1239_v0, %v827_v17 }
 0x161   : > { %v774_v24 = vsub.f32 %v758_v19, %v766_v18  ;;  %v875_v25 = vmul.f32 %v831_v23, %v779_v21 }
 0x162   : > { %v835_v26 = vmul.f32 0.5, %v834_v22 }
 0x163   : > { %v790_v27 = vadd.f32 1e-05, %v774_v24  ;;  %vm883_vm1 = vcmp.ge.f32.partialorder %v875_v25, 0.0  ;;  %v891_v28 = vmul.f32 0.2, %v875_v25 }
 0x164   : > { %v836_v29 = vsub.f32 1.5, %v835_v26  ;;  %v711_v30 = vpop.xlane.xlu2 %710 }
 0x165   : > { %1242 = vrsqrt.f32 %v790_v27  ;;  %v751_v32 = vmul.f32 0.11111111, %v711_v30  ;;  %v899_v33 = vsel %vm883_vm1, %v875_v25, %v891_v28  ;;  %vm858_vm7 = vweird.f32 %v790_v27 }
 0x166   : > { %v837_v36 = vmul.f32 %v1241_v12, %v836_v29  ;;  %v743_v35 = vpop.xlane.xlu1 %742  ;;  %907 = vst.msk [vmem:[%s1512_s26 + $0x18] sm:$0xff] %vm687_vm0, %v899_v33 }
 0x167   : > { %v767_v34 = vmul.f32 %v751_v32, %v751_v32  ;;  %v759_v37 = vmul.f32 0.11111111, %v743_v35  ;;  %v783_v42 = vsub.f32 %v1491_v53, %v751_v32 }
 0x168   : > { %v841_v38 = vsel %vm840_vm4, %v1241_v12, %v837_v36 }
 0x169   : > { %v876_v39 = vmul.f32 %v841_v38, %v780_v9  ;;  %v775_v41 = vsub.f32 %v759_v37, %v767_v34 }
 0x16b   : > { %v1243_v43 = vpop.eup %1242  ;;  %vm884_vm5 = vcmp.ge.f32.partialorder %v876_v39, 0.0  ;;  %v892_v44 = vmul.f32 0.2, %v876_v39  ;;  %v791_v45 = vadd.f32 1e-05, %v775_v41 }
 0x16c   : > { %v853_v46 = vmul.f32 %v1243_v43, %v790_v27  ;;  %v737_v47 = vpop.xlane.xlu2 %736  ;;  %vm859_vm6 = vweird.f32 %v1243_v43 }
 0x16d   : > { %v900_v48 = vsel %vm884_vm5, %v876_v39, %v892_v44  ;;  %1244 = vrsqrt.f32 %v791_v45  ;;  %v757_v52 = vmul.f32 0.11111111, %v737_v47  ;;  %vm860_vm8 = vmor %vm858_vm7, %vm859_vm6  ;;  %vm868_vm11 = vweird.f32 %v791_v45 }
 0x16e   : > { %908 = vst.msk [vmem:[%s1512_s26 + $0x20] sm:$0xff] %vm687_vm0, %v900_v48  ;;  %v854_v20 = vmul.f32 %v1243_v43, %v853_v46 }
 0x16f   : > { %v773_v51 = vsub.f32 %v757_v52, %v765_v50 }
 0x170   : > { %v855_v54 = vmul.f32 0.5, %v854_v20 }
 0x171   : > { %v789_v55 = vadd.f32 1e-05, %v773_v51 }
 0x172   : > { %v856_v56 = vsub.f32 1.5, %v855_v54 }
 0x173   : > { %v1245_v57 = vpop.eup %1244  ;;  %1246 = vrsqrt.f32 %v789_v55  ;;  %vm848_vm15 = vweird.f32 %v789_v55 }
 0x174   : > { %v857_v58 = vmul.f32 %v1243_v43, %v856_v56  ;;  %v863_v59 = vmul.f32 %v1245_v57, %v791_v45  ;;  %vm869_vm10 = vweird.f32 %v1245_v57 }
 0x175   : > { %vm870_vm12 = vmor %vm868_vm11, %vm869_vm10 }
 0x176   : > { %v861_v62 = vsel %vm860_vm8, %v1243_v43, %v857_v58  ;;  %v864_v63 = vmul.f32 %v1245_v57, %v863_v59 }
 0x177   : > { %v878_v49 = vmul.f32 %v861_v62, %v782_v61 }
 0x178   : > { %v865_v0 = vmul.f32 0.5, %v864_v63 }
 0x179   : > { %v1247_v1 = vpop.eup %1246  ;;  %vm886_vm9 = vcmp.ge.f32.partialorder %v878_v49, 0.0  ;;  %v894_v2 = vmul.f32 0.2, %v878_v49 }
 0x17a   : > { %v866_v3 = vsub.f32 1.5, %v865_v0  ;;  %v843_v4 = vmul.f32 %v1247_v1, %v789_v55  ;;  %vm849_vm13 = vweird.f32 %v1247_v1 }
 0x17b   : > { %v902_v5 = vsel %vm886_vm9, %v878_v49, %v894_v2  ;;  %vm850_vm1 = vmor %vm848_vm15, %vm849_vm13 }
 0x17c   : > { %910 = vst.msk [vmem:[%s1512_s26 + $0x30] sm:$0xff] %vm687_vm0, %v902_v5  ;;  %v867_v6 = vmul.f32 %v1245_v57, %v866_v3  ;;  %v844_v7 = vmul.f32 %v1247_v1, %v843_v4 }
 0x17e   : > { %v871_v8 = vsel %vm870_vm12, %v1245_v57, %v867_v6  ;;  %v845_v10 = vmul.f32 0.5, %v844_v7 }
 0x17f   : > { %v879_v11 = vmul.f32 %v871_v8, %v783_v42 }
 0x180   : > { %v846_v12 = vsub.f32 1.5, %v845_v10 }
 0x181   : > { %vm887_vm14 = vcmp.ge.f32.partialorder %v879_v11, 0.0  ;;  %v895_v13 = vmul.f32 0.2, %v879_v11 }
 0x182   : > { %v847_v14 = vmul.f32 %v1247_v1, %v846_v12 }
 0x183   : > { %v903_v60 = vsel %vm887_vm14, %v879_v11, %v895_v13 }
 0x184   : > { %911 = vst.msk [vmem:[%s1512_s26 + $0x38] sm:$0xff] %vm687_vm0, %v903_v60  ;;  %v851_v16 = vsel %vm850_vm1, %v1247_v1, %v847_v14 }
 0x185   : > { %v877_v17 = vmul.f32 %v851_v16, %v781_v15 }
 0x187   : > { %vm885_vm2 = vcmp.ge.f32.partialorder %v877_v17, 0.0  ;;  %v893_v53 = vmul.f32 0.2, %v877_v17 }
 0x189   : > { %v901_v18 = vsel %vm885_vm2, %v877_v17, %v893_v53 }
 0x18a   : > { %909 = vst.msk [vmem:[%s1512_s26 + $0x28] sm:$0xff] %vm687_vm0, %v901_v18 }
 0x18b PF: > { %s13_s12 = sadd.s32 1, %s1254_s12  }
 0x18c   : > { %p10_p4 = scmp.ge.s32.totalorder %s13_s12, 4  }
 0x18e   :  { %12 = sbr.rel (!%p10_p4) target bundleno = 1 (0x1), region = 62 }

// kernel: patch_discriminator_forward.9
= control target key start
LH: loop header
LB: loop body
LE: loop exit
PB: predicated region body
PF: predicated region fallthrough
CT: control target
= control target key end

     0   :  { %s1232_s14 = smov 0   ;;  %s1322_s0 = inlined_call_operand.vmem [shape: bf16[2,1024,4], index: 0, kind: input, shape index: {}]   ;;  %s1323_s1 = inlined_call_operand.vmem [shape: bf16[1,1024], index: 1, kind: input, shape index: {}]   ;;  %s1324_s2 = inlined_call_operand.<no memory space> [shape: f32[1,1], index: 2, kind: input, shape index: {}]   ;;  %s1325_s3 = inlined_call_operand.vmem [shape: f32[2,1,4], index: 3, kind: output, shape index: {}]  }
   0x1   :  { %v8_v0 = vstv %s1324_s2 }
   0x2   :  { %9 = vst [vmem:[#allocation2] sm:$0x1] %v8_v0 }
   0x3 LB: > { %s860_s15 = sadd.s32 4294967295, %s1206_s14   ;;  %p864_p0 = scmp.ge.s32.totalorder %s1206_s14, 1  ;;  %s1206_s14 = sphi %s1232_s14, %s15_s14  }
   0x4   : > { %p139_p1 = scmp.lt.s32.totalorder %s1206_s14, 3 }
   0x6   : > { %p140_p2 = pnand %p864_p0, %p139_p1 }
   0x7   : > { %p161_p3 = scmp.lt.s32.totalorder (!%p140_p2), %s860_s15, 1 }
   0x8   : > { %143 = sbr.rel (%p140_p2) target bundleno = 223 (0xdf), region = 32 }
   0xd   : > { %s1327_s15 = smov (!%p161_p3, %s860_s15), 1  ;;  %v297_v1 = vld [vmem:[%s1323_s1] sm:$0xff]  ;;  %v298_v28 = vld [vmem:[#allocation2] sm:$0x1]  ;;  %v1208_v31 = vmov 0   ;;  %vm811_vm0 = vcmask 24576  }
   0xe   : > { %s1125_s2 = sshll.u32 %s1327_s15, 9  ;;  %306 = vst [vmem:[#allocation1] ss:$9 sm:$0xff] %v297_v1  ;;  %1199 = vset.pattern.permute.xlu0 %v1208_v31  ;;  %s168_s23 = scalar_lea.vmem %s1325_s3, %s1327_s15 }
   0xf   : > { %s1246_s18 = scalar_lea.vmem %s1322_s0, %s1125_s2  ;;  %301 = vperm.xlu0 %1199, %v298_v28  }
  0x10   : > { %v1133_v2 = vld [vmem:[%s1246_s18 + $0x38] sm:$0xff]  ;;  %v1132_v6 = vld [vmem:[%s1246_s18 + $0x30] sm:$0xff]  ;;  %v1131_v10 = vld [vmem:[%s1246_s18 + $0x28] sm:$0xff] }
  0x11   : > { %v1141_v3 = vld [vmem:[%s1246_s18 + $0x78] sm:$0xff]  ;;  %707 = vmatpush.bf16.msra.mxu0 %v1133_v2  ;;  %v1140_v7 = vld [vmem:[%s1246_s18 + $0x70] sm:$0xff]  ;;  %v1139_v11 = vld [vmem:[%s1246_s18 + $0x68] sm:$0xff] }
  0x12   : > { %v1149_v4 = vld [vmem:[%s1246_s18 + $0xb8] sm:$0xff]  ;;  %720 = vmatpush.bf16.msra.mxu1 %v1141_v3  ;;  %v1148_v8 = vld [vmem:[%s1246_s18 + $0xb0] sm:$0xff]  ;;  %v1147_v12 = vld [vmem:[%s1246_s18 + $0xa8] sm:$0xff] }
  0x13   : > { %v1157_v5 = vld [vmem:[%s1246_s18 + $0xf8] sm:$0xff]  ;;  %733 = vmatpush.bf16.msra.mxu2 %v1149_v4  ;;  %v1156_v9 = vld [vmem:[%s1246_s18 + $0xf0] sm:$0xff]  ;;  %v1155_v13 = vld [vmem:[%s1246_s18 + $0xe8] sm:$0xff] }
  0x14   : > { %746 = vmatpush.bf16.msra.mxu3 %v1157_v5  ;;  %v1130_v14 = vld [vmem:[%s1246_s18 + $0x20] sm:$0xff]  ;;  %v1129_v18 = vld [vmem:[%s1246_s18 + $0x18] sm:$0xff]  ;;  %v1128_v22 = vld [vmem:[%s1246_s18 + $0x10] sm:$0xff] }
  0x15   : > { %708 = vmatpush.bf16.msra.mxu0 %v1132_v6  ;;  %v1138_v15 = vld [vmem:[%s1246_s18 + $0x60] sm:$0xff]  ;;  %v1137_v19 = vld [vmem:[%s1246_s18 + $0x58] sm:$0xff]  ;;  %v1136_v23 = vld [vmem:[%s1246_s18 + $0x50] sm:$0xff] }
  0x16   : > { %721 = vmatpush.bf16.msra.mxu1 %v1140_v7  ;;  %v1146_v16 = vld [vmem:[%s1246_s18 + $0xa0] sm:$0xff]  ;;  %v1145_v20 = vld [vmem:[%s1246_s18 + $0x98] sm:$0xff]  ;;  %v1144_v24 = vld [vmem:[%s1246_s18 + $0x90] sm:$0xff] }
  0x17   : > { %734 = vmatpush.bf16.msra.mxu2 %v1148_v8  ;;  %v1154_v17 = vld [vmem:[%s1246_s18 + $0xe0] sm:$0xff]  ;;  %v1153_v21 = vld [vmem:[%s1246_s18 + $0xd8] sm:$0xff]  ;;  %v1152_v25 = vld [vmem:[%s1246_s18 + $0xd0] sm:$0xff] }
  0x18   : > { %747 = vmatpush.bf16.msra.mxu3 %v1156_v9  ;;  %v1127_v26 = vld [vmem:[%s1246_s18 + $0x8] sm:$0xff]  ;;  %v1126_v32 = vld [vmem:[%s1246_s18] sm:$0xff]  ;;  %v1165_v36 = vld [vmem:[%s1246_s18 + $0x138] sm:$0xff] }
  0x19   : > { %709 = vmatpush.bf16.msra.mxu0 %v1131_v10  ;;  %v1135_v27 = vld [vmem:[%s1246_s18 + $0x48] sm:$0xff]  ;;  %v1134_v33 = vld [vmem:[%s1246_s18 + $0x40] sm:$0xff]  ;;  %v1173_v37 = vld [vmem:[%s1246_s18 + $0x178] sm:$0xff] }
  0x1a   : > { %722 = vmatpush.bf16.msra.mxu1 %v1139_v11  ;;  %v1143_v29 = vld [vmem:[%s1246_s18 + $0x88] sm:$0xff]  ;;  %v1142_v34 = vld [vmem:[%s1246_s18 + $0x80] sm:$0xff]  ;;  %v1181_v38 = vld [vmem:[%s1246_s18 + $0x1b8] sm:$0xff] }
  0x1b   : > { %735 = vmatpush.bf16.msra.mxu2 %v1147_v12  ;;  %v1151_v30 = vld [vmem:[%s1246_s18 + $0xc8] sm:$0xff]  ;;  %v1150_v35 = vld [vmem:[%s1246_s18 + $0xc0] sm:$0xff]  ;;  %v1189_v39 = vld [vmem:[%s1246_s18 + $0x1f8] sm:$0xff] }
  0x1c   : > { %748 = vmatpush.bf16.msra.mxu3 %v1155_v13  ;;  %v1164_v40 = vld [vmem:[%s1246_s18 + $0x130] sm:$0xff]  ;;  %v310_v42 = vld [vmem:[#allocation1 + $0x1b] sm:$0xff]  ;;  %v1163_v48 = vld [vmem:[%s1246_s18 + $0x128] sm:$0xff] }
  0x1d   : > { %710 = vmatpush.bf16.msra.mxu0 %v1130_v14  ;;  %v309_v41 = vld [vmem:[#allocation1 + $0x12] sm:$0xff]  ;;  %v307_v44 = vld [vmem:[#allocation1] sm:$0xff]  ;;  %v308_v45 = vld [vmem:[#allocation1 + $0x9] sm:$0xff] }
  0x1e   : > { %723 = vmatpush.bf16.msra.mxu1 %v1138_v15  ;;  %v1172_v43 = vld [vmem:[%s1246_s18 + $0x170] sm:$0xff]  ;;  %v1171_v49 = vld [vmem:[%s1246_s18 + $0x168] sm:$0xff]  ;;  %v1162_v52 = vld [vmem:[%s1246_s18 + $0x120] sm:$0xff] }
  0x1f   : > { %736 = vmatpush.bf16.msra.mxu2 %v1146_v16  ;;  %v1180_v46 = vld [vmem:[%s1246_s18 + $0x1b0] sm:$0xff]  ;;  %v1179_v50 = vld [vmem:[%s1246_s18 + $0x1a8] sm:$0xff]  ;;  %v1170_v53 = vld [vmem:[%s1246_s18 + $0x160] sm:$0xff] }
  0x20   : > { %749 = vmatpush.bf16.msra.mxu3 %v1154_v17  ;;  %v1188_v47 = vld [vmem:[%s1246_s18 + $0x1f0] sm:$0xff]  ;;  %v1187_v51 = vld [vmem:[%s1246_s18 + $0x1e8] sm:$0xff]  ;;  %v1178_v54 = vld [vmem:[%s1246_s18 + $0x1a0] sm:$0xff] }
  0x21   : > { %711 = vmatpush.bf16.msra.mxu0 %v1129_v18  ;;  %v1186_v55 = vld [vmem:[%s1246_s18 + $0x1e0] sm:$0xff]  ;;  %v1161_v56 = vld [vmem:[%s1246_s18 + $0x118] sm:$0xff]  ;;  %v1160_v60 = vld [vmem:[%s1246_s18 + $0x110] sm:$0xff] }
  0x22   : > { %724 = vmatpush.bf16.msra.mxu1 %v1137_v19  ;;  %v1169_v57 = vld [vmem:[%s1246_s18 + $0x158] sm:$0xff]  ;;  %v1168_v61 = vld [vmem:[%s1246_s18 + $0x150] sm:$0xff]  ;;  %v1159_v0 = vld [vmem:[%s1246_s18 + $0x108] sm:$0xff] }
  0x23   : > { %737 = vmatpush.bf16.msra.mxu2 %v1145_v20  ;;  %v1177_v58 = vld [vmem:[%s1246_s18 + $0x198] sm:$0xff]  ;;  %v1176_v62 = vld [vmem:[%s1246_s18 + $0x190] sm:$0xff]  ;;  %v1167_v1 = vld [vmem:[%s1246_s18 + $0x148] sm:$0xff] }
  0x24   : > { %750 = vmatpush.bf16.msra.mxu3 %v1153_v21  ;;  %v1185_v59 = vld [vmem:[%s1246_s18 + $0x1d8] sm:$0xff]  ;;  %v1184_v63 = vld [vmem:[%s1246_s18 + $0x1d0] sm:$0xff]  ;;  %v1175_v2 = vld [vmem:[%s1246_s18 + $0x188] sm:$0xff] }
  0x25   : > { %712 = vmatpush.bf16.msra.mxu0 %v1128_v22  ;;  %v1183_v3 = vld [vmem:[%s1246_s18 + $0x1c8] sm:$0xff]  ;;  %v1158_v4 = vld [vmem:[%s1246_s18 + $0x100] sm:$0xff]  ;;  %v313_v10 = vld [vmem:[#allocation1 + $0x36] sm:$0xff] }
  0x26   : > { %725 = vmatpush.bf16.msra.mxu1 %v1136_v23  ;;  %v1166_v5 = vld [vmem:[%s1246_s18 + $0x140] sm:$0xff]  ;;  %v312_v9 = vld [vmem:[#allocation1 + $0x2d] sm:$0xff] }
  0x27   : > { %738 = vmatpush.bf16.msra.mxu2 %v1144_v24  ;;  %v1174_v6 = vld [vmem:[%s1246_s18 + $0x180] sm:$0xff] }
  0x28   : > { %751 = vmatpush.bf16.msra.mxu3 %v1152_v25  ;;  %v1182_v7 = vld [vmem:[%s1246_s18 + $0x1c0] sm:$0xff] }
  0x29   : > { %713 = vmatpush.bf16.msra.mxu0 %v1127_v26  ;;  %v311_v8 = vld [vmem:[#allocation1 + $0x24] sm:$0xff] }
  0x2a   : > { %726 = vmatpush.bf16.msra.mxu1 %v1135_v27  ;;  %v314_v11 = vld [vmem:[#allocation1 + $0x3f] sm:$0xff] }
  0x2b   : > { %739 = vmatpush.bf16.msra.mxu2 %v1143_v29 }
  0x2c   : > { %752 = vmatpush.bf16.msra.mxu3 %v1151_v30 }
  0x2d   : > { %714 = vmatpush.bf16.msra.mxu0 %v1126_v32 }
  0x2e   : > { %727 = vmatpush.bf16.msra.mxu1 %v1134_v33 }
  0x2f   : > { %740 = vmatpush.bf16.msra.mxu2 %v1142_v34 }
  0x30   : > { %753 = vmatpush.bf16.msra.mxu3 %v1150_v35  ;;  %715 = vmatmul.bf16.vlgmr.msra.gmra.mxu0 %v307_v44 }
  0x31   : > { %759 = vmatpush.bf16.msrb.mxu0 %v1165_v36  ;;  %728 = vmatmul.bf16.vlgmr.msra.gmra.mxu1 %v308_v45 }
  0x32   : > { %772 = vmatpush.bf16.msrb.mxu1 %v1173_v37  ;;  %741 = vmatmul.bf16.vlgmr.msra.gmra.mxu2 %v309_v41 }
  0x33   : > { %785 = vmatpush.bf16.msrb.mxu2 %v1181_v38  ;;  %754 = vmatmul.bf16.vlgmr.msra.gmra.mxu3 %v310_v42 }
  0x34   : > { %798 = vmatpush.bf16.msrb.mxu3 %v1189_v39 }
  0x35   : > { %760 = vmatpush.bf16.msrb.mxu0 %v1164_v40 }
  0x36   : > { %773 = vmatpush.bf16.msrb.mxu1 %v1172_v43 }
  0x37   : > { %786 = vmatpush.bf16.msrb.mxu2 %v1180_v46 }
  0x38   : > { %799 = vmatpush.bf16.msrb.mxu3 %v1188_v47 }
  0x39   : > { %761 = vmatpush.bf16.msrb.mxu0 %v1163_v48 }
  0x3a   : > { %774 = vmatpush.bf16.msrb.mxu1 %v1171_v49 }
  0x3b   : > { %787 = vmatpush.bf16.msrb.mxu2 %v1179_v50 }
  0x3c   : > { %800 = vmatpush.bf16.msrb.mxu3 %v1187_v51 }
  0x3d   : > { %762 = vmatpush.bf16.msrb.mxu0 %v1162_v52 }
  0x3e   : > { %775 = vmatpush.bf16.msrb.mxu1 %v1170_v53 }
  0x3f   : > { %788 = vmatpush.bf16.msrb.mxu2 %v1178_v54 }
  0x40   : > { %801 = vmatpush.bf16.msrb.mxu3 %v1186_v55 }
  0x41   : > { %763 = vmatpush.bf16.msrb.mxu0 %v1161_v56 }
  0x42   : > { %776 = vmatpush.bf16.msrb.mxu1 %v1169_v57 }
  0x43   : > { %789 = vmatpush.bf16.msrb.mxu2 %v1177_v58 }
  0x44   : > { %802 = vmatpush.bf16.msrb.mxu3 %v1185_v59 }
  0x45   : > { %764 = vmatpush.bf16.msrb.mxu0 %v1160_v60 }
  0x46   : > { %777 = vmatpush.bf16.msrb.mxu1 %v1168_v61 }
  0x47   : > { %790 = vmatpush.bf16.msrb.mxu2 %v1176_v62 }
  0x48   : > { %803 = vmatpush.bf16.msrb.mxu3 %v1184_v63 }
  0x49   : > { %765 = vmatpush.bf16.msrb.mxu0 %v1159_v0 }
  0x4a   : > { %778 = vmatpush.bf16.msrb.mxu1 %v1167_v1 }
  0x4b   : > { %791 = vmatpush.bf16.msrb.mxu2 %v1175_v2 }
  0x4c   : > { %804 = vmatpush.bf16.msrb.mxu3 %v1183_v3 }
  0x4d   : > { %766 = vmatpush.bf16.msrb.mxu0 %v1158_v4 }
  0x4e   : > { %779 = vmatpush.bf16.msrb.mxu1 %v1166_v5 }
  0x4f   : > { %792 = vmatpush.bf16.msrb.mxu2 %v1174_v6 }
  0x50   : > { %805 = vmatpush.bf16.msrb.mxu3 %v1182_v7  ;;  %767 = vmatmul.bf16.vlgmr.msrb.gmra.mxu0 %v311_v8 }
  0x51   : > { %780 = vmatmul.bf16.vlgmr.msrb.gmra.mxu1 %v312_v9 }
  0x52   : > { %793 = vmatmul.bf16.vlgmr.msrb.gmra.mxu2 %v313_v10 }
  0x53   : > { %806 = vmatmul.bf16.vlgmr.msrb.gmra.mxu3 %v314_v11 }
  0x81   : > { %v302_v18 = vpop.permute.xlu0 %301 }
  0x82   : > { %v304_v19 = vperm.slane %v302_v18, 0 }
  0xad   : > { %v716_v12 = vpop.f32.mrf.mxu0 }
  0xae   : > { %v729_v13 = vpop.f32.mrf.mxu1  ;;  %v717_v22 = vadd.f32 %v716_v12, %v304_v19 }
  0xb0   : > { %v730_v23 = vadd.f32 %v729_v13, %v717_v22 }
  0xb5   : > { %v742_v14 = vpop.f32.mrf.mxu2  ;;  %v718_v16 = vpop.f32.mrf.mxu0 }
  0xb6   : > { %v755_v15 = vpop.f32.mrf.mxu3  ;;  %v731_v17 = vpop.f32.mrf.mxu1  ;;  %v743_v24 = vadd.f32 %v742_v14, %v730_v23 }
  0xb8   : > { %v756_v25 = vadd.f32 %v755_v15, %v743_v24 }
  0xbd   : > { %v744_v20 = vpop.f32.mrf.mxu2 }
  0xbe   : > { %v757_v21 = vpop.f32.mrf.mxu3 }
  0xcd   : > { %v768_v26 = vpop.f32.mrf.mxu0 }
  0xce   : > { %v781_v27 = vpop.f32.mrf.mxu1  ;;  %v769_v28 = vadd.f32 %v768_v26, %v756_v25 }
  0xd0   : > { %v782_v29 = vadd.f32 %v781_v27, %v769_v28 }
  0xd5   : > { %v794_v30 = vpop.f32.mrf.mxu2  ;;  %v770_v33 = vpop.f32.mrf.mxu0 }
  0xd6   : > { %v807_v31 = vpop.f32.mrf.mxu3  ;;  %v795_v32 = vadd.f32 %v794_v30, %v782_v29  ;;  %v783_v34 = vpop.f32.mrf.mxu1 }
  0xd8   : > { %v808_v35 = vadd.f32 %v807_v31, %v795_v32 }
  0xda   : > { %812 = vst.msk [vmem:[%s168_s23] sm:$0x1] %vm811_vm0, %v808_v35 }
  0xdd   : > { %v796_v36 = vpop.f32.mrf.mxu2 }
  0xde   : > { %v809_v37 = vpop.f32.mrf.mxu3 }
  0xdf PF: > { %s15_s14 = sadd.s32 1, %s1206_s14  }
  0xe0   : > { %p12_p4 = scmp.ge.s32.totalorder %s15_s14, 4  }
  0xe2   :  { %14 = sbr.rel (!%p12_p4) target bundleno = 3 (0x3), region = 62 }

</bundles_post_ra>
